<compile_context>
chip_gen: v5e
topology: v5e:2x2
jax: 0.10.0
libtpu: 0.0.40
codegen_flags: <defaults>
</compile_context>

<pallas_src>
import jax
import jax.numpy as jnp
from jax.experimental import pallas as pl
from jax.experimental.pallas import tpu as pltpu


# --------------------------------------------------------------------------- #
# Kernel
# --------------------------------------------------------------------------- #
def _nnlogreg_kernel(
    x_ref,                      # (TB, D)  f32
    w1_ref, b1_ref,             # (D, H) bf16, (1, H) f32
    w2_ref, b2_ref,             # (H, H) bf16, (1, H) f32
    w3_ref, b3_ref,             # (H, D) bf16 (pre-scaled 0.5), (1, D) f32 (pre-scaled 0.5)
    m_ref,                      # (1, TB)  f32 out : M = sum(A*x, axis=1), lane-dense
    a_ref,                      # (TB, D)  f32 out : softmax attention A
):
    x = x_ref[...]                                            # f32 (TB, D)

    # hypernet: Linear -> Tanh -> Linear -> Tanh -> Linear
    # bf16 operands on the MXU, f32 accumulation / elementwise.
    h1 = jnp.tanh(
        jnp.dot(x.astype(jnp.bfloat16), w1_ref[...],
                preferred_element_type=jnp.float32) + b1_ref[...]
    )
    h2 = jnp.tanh(
        jnp.dot(h1.astype(jnp.bfloat16), w2_ref[...],
                preferred_element_type=jnp.float32) + b2_ref[...]
    )
    # w3/b3 are pre-scaled by 0.5 in prepare_params, so z3 == 0.5 * z3_torch.
    z3 = jnp.dot(h2.astype(jnp.bfloat16), w3_ref[...],
                 preferred_element_type=jnp.float32) + b3_ref[...]

    # softmax(sigmoid(z3_torch)) with the constant exp(0.5) factor cancelled:
    #   sigmoid(z) = 0.5*tanh(z/2) + 0.5
    #   exp(sigmoid(z)) = e^0.5 * exp(0.5*tanh(z/2))   -> e^0.5 cancels in the
    # normalization, and tanh inputs are exact, so A is bit-equivalent to the
    # reference softmax(sigmoid(.)) up to f32 rounding.
    e = jnp.exp(0.5 * jnp.tanh(z3))                           # (TB, D), values in (e^-0.5, e^0.5)
    inv = pl.reciprocal(jnp.sum(e, axis=1, keepdims=True))    # exact 1/x per row
    a = e * inv                                               # (TB, D)

    a_ref[...] = a
    # Lane-dense M: one cheap XLU relayout (TB,) -> (1, TB) instead of a
    # lane-width-1 (TB, 1) store that would need masked writebacks.
    m_ref[...] = jnp.sum(a * x, axis=1)[None, :]


# --------------------------------------------------------------------------- #
# Tiling / wrapper
# --------------------------------------------------------------------------- #
def _round_up(x, m):
    return (x + m - 1) // m * m


def _pick_tile_b(B):
    """Batch tile size.

    - B <= 128:   single fat grid step (splitting would only add per-step
                  overhead / padding at these sizes).
    - B <= 1024:  exactly two steps, rows rounded to a multiple of 128 so both
                  v7x TensorCores get a balanced share and the lane-dense M
                  block stays layout-legal.
    - larger:     512-row tiles -- amortizes the ~0.35 us/step overhead, keeps
                  the double-buffered x/A blocks + matmul intermediates well
                  inside v5e's scoped VMEM, and yields >= 2 grid steps.
    """
    if B <= 128:
        return _round_up(B, 8)
    if B <= 1024:
        return _round_up(pl.cdiv(B, 2), 128)
    return 512


def prepare_params(params):
    """One-time parameter prep (hoisted out of the per-call path):
    bf16 weight copies for the MXU and the 0.5 sigmoid-fold on (w3, b3)."""
    w1, b1, w2, b2, w3, b3, wc, bc = params
    return (
        w1.astype(jnp.bfloat16), b1,
        w2.astype(jnp.bfloat16), b2,
        (0.5 * w3).astype(jnp.bfloat16), 0.5 * b3,
        wc, bc,
    )


def nnlogreg_forward(x, prepared_params, *, tile_b=None):
    """x: (B, D) float32.  prepared_params: output of prepare_params().
    Returns (out_prob (B,), out_hat (B,), A (B, D))."""
    w1, b1, w2, b2, w3, b3, wc, bc = prepared_params
    B, D = x.shape
    H = w1.shape[1]

    if tile_b is None:
        tile_b = _pick_tile_b(B)
    num_tiles = pl.cdiv(B, tile_b)
    B_pad = num_tiles * tile_b
    # Lane-dense M block (1, tile_b) must be a multiple of 128 lanes unless it
    # is the whole row.
    assert num_tiles == 1 or tile_b % 128 == 0, "tile_b must be a multiple of 128 when tiling"

    # Pad the batch instead of collapsing to tiny tiles / failing on awkward B.
    x_pad = x if B_pad == B else jnp.pad(x, ((0, B_pad - B), (0, 0)))

    # Weights/biases are grid-resident (constant index_map); single-buffer them
    # so they don't reserve a useless second VMEM copy.
    def resident(shape):
        return pl.BlockSpec(shape, lambda i: (0, 0), pipeline_mode=pl.Buffered(1))

    M_row, A_pad = pl.pallas_call(
        _nnlogreg_kernel,
        out_shape=(
            jax.ShapeDtypeStruct((1, B_pad), jnp.float32),   # M (lane-dense row)
            jax.ShapeDtypeStruct((B_pad, D), jnp.float32),   # A
        ),
        grid_spec=pltpu.PrefetchScalarGridSpec(
            num_scalar_prefetch=0,
            grid=(num_tiles,),
            in_specs=[
                pl.BlockSpec((tile_b, D), lambda i: (i, 0)),   # x
                resident((D, H)), resident((1, H)),            # w1, b1
                resident((H, H)), resident((1, H)),            # w2, b2
                resident((H, D)), resident((1, D)),            # w3, b3
            ],
            out_specs=(
                pl.BlockSpec((1, tile_b), lambda i: (0, i)),   # M lane slice
                pl.BlockSpec((tile_b, D), lambda i: (i, 0)),   # A
            ),
        ),
        compiler_params=pltpu.CompilerParams(
            dimension_semantics=("parallel",),
            vmem_limit_bytes=48 * 1024 * 1024,
        ),
    )(x_pad, w1, b1, w2, b2, w3, b3)

    M = M_row[0, :B]                                          # (B,)
    A = A_pad[:B]                                             # (B, D)

    # Classifier Linear(1,1) + Sigmoid + threshold: negligible work on a (B,)
    # vector, done in plain XLA to keep the kernel's outputs lane-dense.
    logits = M * wc[0, 0] + bc[0, 0]
    out_prob = jax.nn.sigmoid(logits)
    out_hat = (out_prob >= 0.5).astype(jnp.float32)
    return out_prob, out_hat, A


# --------------------------------------------------------------------------- #
# Init / reference / test
# --------------------------------------------------------------------------- #
def init_params(key, repr_length, hidden):
    """Init matching PyTorch Linear's U(-1/sqrt(fan_in), +1/sqrt(fan_in)).
    Weights stored as (in_features, out_features), i.e. kernel does x @ W + b."""
    ks = jax.random.split(key, 8)

    def linear(kw, kb, fan_in, fan_out):
        bound = 1.0 / jnp.sqrt(jnp.float32(fan_in))
        w = jax.random.uniform(kw, (fan_in, fan_out), jnp.float32, -bound, bound)
        b = jax.random.uniform(kb, (1, fan_out), jnp.float32, -bound, bound)
        return w, b

    w1, b1 = linear(ks[0], ks[1], repr_length, hidden)
    w2, b2 = linear(ks[2], ks[3], hidden, hidden)
    w3, b3 = linear(ks[4], ks[5], hidden, repr_length)
    wc, bc = linear(ks[6], ks[7], 1, 1)
    return (w1, b1, w2, b2, w3, b3, wc, bc)


def reference_forward(x, raw_params):
    """Pure-JAX f32 reference matching the PyTorch module."""
    w1, b1, w2, b2, w3, b3, wc, bc = raw_params
    h1 = jnp.tanh(x @ w1 + b1)
    h2 = jnp.tanh(h1 @ w2 + b2)
    a = jax.nn.sigmoid(h2 @ w3 + b3)
    a = jax.nn.softmax(a, axis=1)
    m = jnp.sum(a * x, axis=1)
    prob = jax.nn.sigmoid(m * wc[0, 0] + bc[0, 0])
    hat = (prob >= 0.5).astype(jnp.float32)
    return prob, hat, a


def _run_and_check(x, raw_params, prepared_params):
    B, D = x.shape
    out_prob, out_hat, A = nnlogreg_forward(x, prepared_params)
    jax.block_until_ready((out_prob, out_hat, A))

    assert out_prob.shape == (B,)
    assert out_hat.shape == (B,)
    assert A.shape == (B, D)
    assert bool(jnp.all(jnp.isfinite(out_prob)))
    assert bool(jnp.all(jnp.isfinite(A)))
    # softmax rows must sum to ~1 (exact reciprocal -> f32 rounding only)
    assert bool(jnp.all(jnp.abs(jnp.sum(A, axis=1) - 1.0) < 1e-3))

    # loose parity vs f32 reference (bf16 MXU operands -> small deviations)
    prob_ref, _, A_ref = reference_forward(x, raw_params)
    assert float(jnp.max(jnp.abs(A - A_ref))) < 1e-3
    assert float(jnp.max(jnp.abs(out_prob - prob_ref))) < 2e-2
    return out_prob, out_hat, A


if __name__ == "__main__":
    # Small shapes consistent with the module: repr_length -> 512, hidden 1000 -> 256.
    D, H = 512, 256
    key = jax.random.PRNGKey(0)
    kx1, kx2, kp = jax.random.split(key, 3)

    raw = init_params(kp, D, H)
    prepared = prepare_params(raw)

    # 1) small batch: single fat grid step.
    x_small = jax.random.normal(kx1, (16, D), dtype=jnp.float32)
    _run_and_check(x_small, raw, prepared)

    # 2) medium batch (not a multiple of the tile): exercises batch padding,
    #    the 2-step "parallel" grid (v7x megacore) and the lane-sliced M path.
    x_med = jax.random.normal(kx2, (300, D), dtype=jnp.float32)
    _run_and_check(x_med, raw, prepared)

    print("KERNEL_OK")
</pallas_src>

<mosaic_0001>
module attributes {stable_mosaic.version = 11 : i64} {
  func.func @_nnlogreg_kernel(%arg0: i32, %arg1: memref<16x512xf32, #tpu.memory_space<vmem>>, %arg2: memref<512x256xbf16, #tpu.memory_space<vmem>>, %arg3: memref<1x256xf32, #tpu.memory_space<vmem>>, %arg4: memref<256x256xbf16, #tpu.memory_space<vmem>>, %arg5: memref<1x256xf32, #tpu.memory_space<vmem>>, %arg6: memref<256x512xbf16, #tpu.memory_space<vmem>>, %arg7: memref<1x512xf32, #tpu.memory_space<vmem>>, %arg8: memref<1x16xf32, #tpu.memory_space<vmem>>, %arg9: memref<16x512xf32, #tpu.memory_space<vmem>>) attributes {dimension_semantics = [#tpu.dimension_semantics<parallel>], iteration_bounds = array<i64: 1>, scalar_prefetch = 0 : i64, scratch_operands = 0 : i64, tpu.core_type = #tpu.core_type<tc>, window_params = [{transform_indices = @transform_0, window_bounds = array<i64: 16, 512>}, {pipeline_mode = #tpu.pipeline_mode<synchronous>, transform_indices = @transform_1, window_bounds = array<i64: 512, 256>}, {pipeline_mode = #tpu.pipeline_mode<synchronous>, transform_indices = @transform_2, window_bounds = array<i64: 1, 256>}, {pipeline_mode = #tpu.pipeline_mode<synchronous>, transform_indices = @transform_3, window_bounds = array<i64: 256, 256>}, {pipeline_mode = #tpu.pipeline_mode<synchronous>, transform_indices = @transform_4, window_bounds = array<i64: 1, 256>}, {pipeline_mode = #tpu.pipeline_mode<synchronous>, transform_indices = @transform_5, window_bounds = array<i64: 256, 512>}, {pipeline_mode = #tpu.pipeline_mode<synchronous>, transform_indices = @transform_6, window_bounds = array<i64: 1, 512>}, {transform_indices = @transform_7, window_bounds = array<i64: 1, 16>}, {transform_indices = @transform_8, window_bounds = array<i64: 16, 512>}]} {
    %c0 = arith.constant 0 : index
    %c0_0 = arith.constant 0 : index
    %0 = vector.load %arg1[%c0, %c0_0] : memref<16x512xf32, #tpu.memory_space<vmem>>, vector<16x512xf32>
    %1 = arith.truncf %0 : vector<16x512xf32> to vector<16x512xbf16>
    %c0_1 = arith.constant 0 : index
    %c0_2 = arith.constant 0 : index
    %2 = vector.load %arg2[%c0_1, %c0_2] : memref<512x256xbf16, #tpu.memory_space<vmem>>, vector<512x256xbf16>
    %cst = arith.constant dense<0.000000e+00> : vector<16x256xf32>
    %3 = tpu.matmul %1, %2, %cst {dimension_numbers = #tpu.dot_dimension_numbers<[1], [0], [0], [1], [0, 0, 1, 1], [], []>} : vector<16x512xbf16>, vector<512x256xbf16>, vector<16x256xf32> -> vector<16x256xf32>
    %c0_3 = arith.constant 0 : index
    %c0_4 = arith.constant 0 : index
    %4 = vector.load %arg3[%c0_3, %c0_4] : memref<1x256xf32, #tpu.memory_space<vmem>>, vector<1x256xf32>
    %5 = vector.broadcast %4 : vector<1x256xf32> to vector<16x256xf32>
    %6 = arith.addf %3, %5 : vector<16x256xf32>
    %7 = math.tanh %6 : vector<16x256xf32>
    %8 = arith.truncf %7 : vector<16x256xf32> to vector<16x256xbf16>
    %c0_5 = arith.constant 0 : index
    %c0_6 = arith.constant 0 : index
    %9 = vector.load %arg4[%c0_5, %c0_6] : memref<256x256xbf16, #tpu.memory_space<vmem>>, vector<256x256xbf16>
    %cst_7 = arith.constant dense<0.000000e+00> : vector<16x256xf32>
    %10 = tpu.matmul %8, %9, %cst_7 {dimension_numbers = #tpu.dot_dimension_numbers<[1], [0], [0], [1], [0, 0, 1, 1], [], []>} : vector<16x256xbf16>, vector<256x256xbf16>, vector<16x256xf32> -> vector<16x256xf32>
    %c0_8 = arith.constant 0 : index
    %c0_9 = arith.constant 0 : index
    %11 = vector.load %arg5[%c0_8, %c0_9] : memref<1x256xf32, #tpu.memory_space<vmem>>, vector<1x256xf32>
    %12 = vector.broadcast %11 : vector<1x256xf32> to vector<16x256xf32>
    %13 = arith.addf %10, %12 : vector<16x256xf32>
    %14 = math.tanh %13 : vector<16x256xf32>
    %15 = arith.truncf %14 : vector<16x256xf32> to vector<16x256xbf16>
    %c0_10 = arith.constant 0 : index
    %c0_11 = arith.constant 0 : index
    %16 = vector.load %arg6[%c0_10, %c0_11] : memref<256x512xbf16, #tpu.memory_space<vmem>>, vector<256x512xbf16>
    %cst_12 = arith.constant dense<0.000000e+00> : vector<16x512xf32>
    %17 = tpu.matmul %15, %16, %cst_12 {dimension_numbers = #tpu.dot_dimension_numbers<[1], [0], [0], [1], [0, 0, 1, 1], [], []>} : vector<16x256xbf16>, vector<256x512xbf16>, vector<16x512xf32> -> vector<16x512xf32>
    %c0_13 = arith.constant 0 : index
    %c0_14 = arith.constant 0 : index
    %18 = vector.load %arg7[%c0_13, %c0_14] : memref<1x512xf32, #tpu.memory_space<vmem>>, vector<1x512xf32>
    %19 = vector.broadcast %18 : vector<1x512xf32> to vector<16x512xf32>
    %20 = arith.addf %17, %19 : vector<16x512xf32>
    %21 = math.tanh %20 : vector<16x512xf32>
    %cst_15 = arith.constant 5.000000e-01 : f32
    %22 = vector.broadcast %cst_15 : f32 to vector<16x512xf32>
    %23 = arith.mulf %22, %21 : vector<16x512xf32>
    %24 = math.exp %23 : vector<16x512xf32>
    %cst_16 = arith.constant dense<0.000000e+00> : vector<16xf32>
    %25 = vector.multi_reduction <add>, %24, %cst_16 [1] : vector<16x512xf32> to vector<16xf32>
    %26 = vector.shape_cast %25 : vector<16xf32> to vector<16x1xf32>
    %27 = tpu.reciprocal %26 : vector<16x1xf32> -> vector<16x1xf32>
    %28 = vector.broadcast %27 : vector<16x1xf32> to vector<16x512xf32>
    %29 = arith.mulf %24, %28 : vector<16x512xf32>
    %c0_17 = arith.constant 0 : index
    %c0_18 = arith.constant 0 : index
    %30 = vector.load %arg9[%c0_17, %c0_18] : memref<16x512xf32, #tpu.memory_space<vmem>>, vector<16x512xf32>
    tpu.vector_store %arg9[%c0_17, %c0_18], %29 {strides = array<i32>} : memref<16x512xf32, #tpu.memory_space<vmem>>, vector<16x512xf32>,
    %31 = arith.mulf %29, %0 : vector<16x512xf32>
    %cst_19 = arith.constant dense<0.000000e+00> : vector<16xf32>
    %32 = vector.multi_reduction <add>, %31, %cst_19 [1] : vector<16x512xf32> to vector<16xf32>
    %33 = vector.shape_cast %32 : vector<16xf32> to vector<1x16xf32>
    %c0_20 = arith.constant 0 : index
    %c0_21 = arith.constant 0 : index
    %34 = vector.load %arg8[%c0_20, %c0_21] : memref<1x16xf32, #tpu.memory_space<vmem>>, vector<1x16xf32>
    tpu.vector_store %arg8[%c0_20, %c0_21], %33 {strides = array<i32>} : memref<1x16xf32, #tpu.memory_space<vmem>>, vector<1x16xf32>,
    return
  }
  func.func @transform_0(%arg0: i32) -> (i32, i32) {
    %c0_i32 = arith.constant 0 : i32
    %c0_i32_0 = arith.constant 0 : i32
    return %arg0, %c0_i32 : i32, i32
  }
  func.func @transform_1(%arg0: i32) -> (i32, i32) {
    %c0_i32 = arith.constant 0 : i32
    %c0_i32_0 = arith.constant 0 : i32
    %c0_i32_1 = arith.constant 0 : i32
    return %c0_i32, %c0_i32_0 : i32, i32
  }
  func.func @transform_2(%arg0: i32) -> (i32, i32) {
    %c0_i32 = arith.constant 0 : i32
    %c0_i32_0 = arith.constant 0 : i32
    %c0_i32_1 = arith.constant 0 : i32
    return %c0_i32, %c0_i32_0 : i32, i32
  }
  func.func @transform_3(%arg0: i32) -> (i32, i32) {
    %c0_i32 = arith.constant 0 : i32
    %c0_i32_0 = arith.constant 0 : i32
    %c0_i32_1 = arith.constant 0 : i32
    return %c0_i32, %c0_i32_0 : i32, i32
  }
  func.func @transform_4(%arg0: i32) -> (i32, i32) {
    %c0_i32 = arith.constant 0 : i32
    %c0_i32_0 = arith.constant 0 : i32
    %c0_i32_1 = arith.constant 0 : i32
    return %c0_i32, %c0_i32_0 : i32, i32
  }
  func.func @transform_5(%arg0: i32) -> (i32, i32) {
    %c0_i32 = arith.constant 0 : i32
    %c0_i32_0 = arith.constant 0 : i32
    %c0_i32_1 = arith.constant 0 : i32
    return %c0_i32, %c0_i32_0 : i32, i32
  }
  func.func @transform_6(%arg0: i32) -> (i32, i32) {
    %c0_i32 = arith.constant 0 : i32
    %c0_i32_0 = arith.constant 0 : i32
    %c0_i32_1 = arith.constant 0 : i32
    return %c0_i32, %c0_i32_0 : i32, i32
  }
  func.func @transform_7(%arg0: i32) -> (i32, i32) {
    %c0_i32 = arith.constant 0 : i32
    %c0_i32_0 = arith.constant 0 : i32
    return %c0_i32, %arg0 : i32, i32
  }
  func.func @transform_8(%arg0: i32) -> (i32, i32) {
    %c0_i32 = arith.constant 0 : i32
    %c0_i32_0 = arith.constant 0 : i32
    return %arg0, %c0_i32 : i32, i32
  }
}

</mosaic_0001>

<bundles_post_ra>
// kernel: tpu_custom_call.1
= control target key start
LH: loop header
LB: loop body
LE: loop exit
PB: predicated region body
PF: predicated region fallthrough
CT: control target
= control target key end

     0   :  { %14 = vsyncpa [#allocation3], 0  ;;  %s2750_s0 = inlined_call_operand.hbm [shape: f32[16,512], index: 0, kind: input, shape index: {}]   ;;  %s2751_s1 = inlined_call_operand.hbm [shape: bf16[512,256], index: 1, kind: input, shape index: {}]   ;;  %s2752_s2 = inlined_call_operand.hbm [shape: f32[1,256], index: 2, kind: input, shape index: {}]   ;;  %s2753_s3 = inlined_call_operand.hbm [shape: bf16[256,256], index: 3, kind: input, shape index: {}]   ;;  %s2754_s4 = inlined_call_operand.hbm [shape: f32[1,256], index: 4, kind: input, shape index: {}]   ;;  %s2755_s5 = inlined_call_operand.hbm [shape: bf16[256,512], index: 5, kind: input, shape index: {}]   ;;  %s2756_s6 = inlined_call_operand.vmem [shape: f32[1,512], index: 6, kind: input, shape index: {}]   ;;  %s2757_s7 = inlined_call_operand.hbm [shape: f32[1,16], index: 7, kind: output, shape index: {0}]   ;;  %s2758_s8 = inlined_call_operand.hbm [shape: f32[16,512], index: 8, kind: output, shape index: {1}]  }
   0x1   :  { %15 = vsyncpa [#allocation6], 0 }
   0x2   :  { %16 = vsyncpa [#allocation9], 0 }
   0x3   :  { %17 = vsyncpa [#allocation12], 0 }
   0x4   :  { %18 = vsyncpa [#allocation4], 0  ;;  %s37_s29 = sshll.u32 %s2751_s1, 4  ;;  %s38_s29 = int_to_ptr.hbm [resolvable:$true] %s37_s29 }
   0x5   :  { %19 = vsyncpa [#allocation15], 0  ;;  %s2638_s30 = smov [#allocation5]   ;;  %s61_s12 = sshll.u32 %s2753_s3, 4  ;;  %s62_s12 = int_to_ptr.hbm [resolvable:$true] %s61_s12 }
   0x6   :  { %s39_s9 = sshll.u32 %s2638_s30, 4  ;;  %s2639_s13 = smov 128   ;;  %s40_s9 = int_to_ptr.vmem [resolvable:$true] %s39_s9 }
   0x7   :  { %s2640_s14 = smov 8   ;;  %s2641_s15 = smov [#allocation8]  }
   0x8   :  { %45 = dma.hbm_to_vmem [thread:$0]  %s38_s29, 8192, %s40_s9, [#allocation6], %s2639_s13, %s2639_s13, %s2640_s14  }
   0x9   :  { %s63_s16 = sshll.u32 %s2641_s15, 4  ;;  %s24_s19 = sshll.u32 %s2750_s0, 4  ;;  %s64_s16 = int_to_ptr.vmem [resolvable:$true] %s63_s16  ;;  %s25_s19 = int_to_ptr.hbm [resolvable:$true] %s24_s19 }
   0xa   :  { %69 = dma.hbm_to_vmem [thread:$0]  %s62_s12, 4096, %s64_s16, [#allocation9], %s2639_s13, %s2639_s13, %s2640_s14  }
   0xb   :  { %s2642_s1 = smov [#allocation2]   ;;  %s51_s3 = sshll.u32 %s2752_s2, 4  ;;  %s52_s3 = int_to_ptr.hbm [resolvable:$true] %s51_s3 }
   0xc   :  { %s26_s20 = sshll.u32 %s2642_s1, 4  ;;  %s2643_s23 = smov 512   ;;  %s27_s20 = int_to_ptr.vmem [resolvable:$true] %s26_s20 }
   0xd   :  { %s2644_s24 = smov 32   ;;  %s2645_s25 = smov [#allocation7]  }
   0xe   :  { %32 = dma.hbm_to_vmem [thread:$0]  %s25_s19, 1024, %s27_s20, [#allocation3], %s2643_s23, %s2643_s23, %s2644_s24  }
   0xf   :  { %s53_s26 = sshll.u32 %s2645_s25, 4  ;;  %s75_s28 = sshll.u32 %s2754_s4, 4  ;;  %s54_s26 = int_to_ptr.vmem [resolvable:$true] %s53_s26  ;;  %s76_s28 = int_to_ptr.hbm [resolvable:$true] %s75_s28 }
  0x10   :  { %56 = dma.hbm_to_vmem [thread:$0]  %s52_s3, 32, %s54_s26, [#allocation6]  }
  0x11   :  { %s85_s2 = sshll.u32 %s2755_s5, 4  ;;  %s2646_s9 = smov [#allocation10]   ;;  %s86_s2 = int_to_ptr.hbm [resolvable:$true] %s85_s2 }
  0x12   :  { %s77_s10 = sshll.u32 %s2646_s9, 4  ;;  %s2647_s11 = smov [#allocation11]   ;;  %s78_s10 = int_to_ptr.vmem [resolvable:$true] %s77_s10 }
  0x13   :  { %80 = dma.hbm_to_vmem [thread:$0]  %s76_s28, 32, %s78_s10, [#allocation9]  }
  0x14   :  { %s87_s12 = sshll.u32 %s2647_s11, 4  ;;  %s2648_s13 = smov 256   ;;  %s88_s12 = int_to_ptr.vmem [resolvable:$true] %s87_s12 }
  0x15   :  { %s2649_s14 = smov 16  }
  0x16   :  { %93 = dma.hbm_to_vmem [thread:$0]  %s86_s2, 8192, %s88_s12, [#allocation12], %s2648_s13, %s2648_s13, %s2649_s14  }
  0x17   :  { %2626 = dma.done.wait [#allocation3], 1024  }
  0x18   :  { %2627 = vsyncadd [#allocation3], 4294966272 }
  0x19   :  { %2628 = dma.done.wait [#allocation6], 8224  }
  0x1a   :  { %2629 = vsyncadd [#allocation6], 4294959072 }
  0x1b   :  { %2630 = dma.done.wait [#allocation9], 4128  }
  0x1c   :  { %2631 = vsyncadd [#allocation9], 4294963168 }
  0x1d   :  { %2632 = dma.done.wait [#allocation12], 8192  }
  0x1e   :  { %2633 = vsyncadd [#allocation12], 4294959104  ;;  %v1618_v0 = vld [vmem:[#allocation5 + $0x70] sm:$0xf]  ;;  %v2215_v1 = vld [vmem:[#allocation5 + $0x74] sm:$0xf0] }
  0x1f   :  { %v1682_v2 = vld [vmem:[#allocation5 + $0xf0] sm:$0xf]  ;;  %v1619_v3 = vor.u32 %v2215_v1, %v1618_v0  ;;  %v2231_v4 = vld [vmem:[#allocation5 + $0xf4] sm:$0xf0]  ;;  %v1610_v11 = vld [vmem:[#allocation5 + $0x60] sm:$0xf] }
  0x20   :  { %v1746_v5 = vld [vmem:[#allocation5 + $0x170] sm:$0xf]  ;;  %v2247_v6 = vld [vmem:[#allocation5 + $0x174] sm:$0xf0]  ;;  %v1683_v7 = vor.u32 %v2231_v4, %v1682_v2  ;;  %v2213_v13 = vld [vmem:[#allocation5 + $0x64] sm:$0xf0] }
  0x21   :  { %v1747_v8 = vor.u32 %v2247_v6, %v1746_v5  ;;  %v1810_v9 = vld [vmem:[#allocation5 + $0x1f0] sm:$0xf]  ;;  %v2263_v10 = vld [vmem:[#allocation5 + $0x1f4] sm:$0xf0]  ;;  %522 = vmatpush.bf16.msra.mxu0 %v1619_v3  ;;  %v1674_v14 = vld [vmem:[#allocation5 + $0xe0] sm:$0xf]  ;;  %v1611_v16 = vor.u32 %v2213_v13, %v1610_v11 }
  0x22   :  { %v1811_v12 = vor.u32 %v2263_v10, %v1810_v9  ;;  %v2229_v15 = vld [vmem:[#allocation5 + $0xe4] sm:$0xf0]  ;;  %536 = vmatpush.bf16.msra.mxu1 %v1683_v7  ;;  %v1738_v18 = vld [vmem:[#allocation5 + $0x160] sm:$0xf]  ;;  %v1602_v23 = vld [vmem:[#allocation5 + $0x50] sm:$0xf] }
  0x23   :  { %550 = vmatpush.bf16.msra.mxu2 %v1747_v8  ;;  %v1675_v17 = vor.u32 %v2229_v15, %v1674_v14  ;;  %v2245_v19 = vld [vmem:[#allocation5 + $0x164] sm:$0xf0]  ;;  %v1802_v20 = vld [vmem:[#allocation5 + $0x1e0] sm:$0xf]  ;;  %v2211_v24 = vld [vmem:[#allocation5 + $0x54] sm:$0xf0] }
  0x24   :  { %564 = vmatpush.bf16.msra.mxu3 %v1811_v12  ;;  %v1739_v21 = vor.u32 %v2245_v19, %v1738_v18  ;;  %v2261_v22 = vld [vmem:[#allocation5 + $0x1e4] sm:$0xf0]  ;;  %v1666_v26 = vld [vmem:[#allocation5 + $0xd0] sm:$0xf]  ;;  %v2227_v27 = vld [vmem:[#allocation5 + $0xd4] sm:$0xf0]  ;;  %v1603_v29 = vor.u32 %v2211_v24, %v1602_v23 }
  0x25   :  { %v1803_v25 = vor.u32 %v2261_v22, %v1802_v20  ;;  %v1730_v28 = vld [vmem:[#allocation5 + $0x150] sm:$0xf]  ;;  %523 = vmatpush.bf16.msra.mxu0 %v1611_v16  ;;  %v2243_v30 = vld [vmem:[#allocation5 + $0x154] sm:$0xf0]  ;;  %v1667_v33 = vor.u32 %v2227_v27, %v1666_v26  ;;  %v1594_v35 = vld [vmem:[#allocation5 + $0x40] sm:$0xf] }
  0x26   :  { %v1794_v31 = vld [vmem:[#allocation5 + $0x1d0] sm:$0xf]  ;;  %v2259_v32 = vld [vmem:[#allocation5 + $0x1d4] sm:$0xf0]  ;;  %537 = vmatpush.bf16.msra.mxu1 %v1675_v17  ;;  %v1731_v34 = vor.u32 %v2243_v30, %v1730_v28  ;;  %v2209_v36 = vld [vmem:[#allocation5 + $0x44] sm:$0xf0] }
  0x27   :  { %551 = vmatpush.bf16.msra.mxu2 %v1739_v21  ;;  %v1658_v37 = vld [vmem:[#allocation5 + $0xc0] sm:$0xf]  ;;  %v1795_v38 = vor.u32 %v2259_v32, %v1794_v31  ;;  %v2225_v39 = vld [vmem:[#allocation5 + $0xc4] sm:$0xf0]  ;;  %v1595_v44 = vor.u32 %v2209_v36, %v1594_v35  ;;  %v1586_v47 = vld [vmem:[#allocation5 + $0x30] sm:$0xf] }
  0x28   :  { %565 = vmatpush.bf16.msra.mxu3 %v1803_v25  ;;  %v1722_v40 = vld [vmem:[#allocation5 + $0x140] sm:$0xf]  ;;  %v2241_v41 = vld [vmem:[#allocation5 + $0x144] sm:$0xf0]  ;;  %v1659_v45 = vor.u32 %v2225_v39, %v1658_v37  ;;  %v2207_v48 = vld [vmem:[#allocation5 + $0x34] sm:$0xf0] }
  0x29   :  { %v1786_v42 = vld [vmem:[#allocation5 + $0x1c0] sm:$0xf]  ;;  %v2257_v43 = vld [vmem:[#allocation5 + $0x1c4] sm:$0xf0]  ;;  %524 = vmatpush.bf16.msra.mxu0 %v1603_v29  ;;  %v1723_v46 = vor.u32 %v2241_v41, %v1722_v40  ;;  %v1650_v49 = vld [vmem:[#allocation5 + $0xb0] sm:$0xf]  ;;  %v1587_v56 = vor.u32 %v2207_v48, %v1586_v47 }
  0x2a   :  { %538 = vmatpush.bf16.msra.mxu1 %v1667_v33  ;;  %v1787_v50 = vor.u32 %v2257_v43, %v1786_v42  ;;  %v2223_v51 = vld [vmem:[#allocation5 + $0xb4] sm:$0xf0]  ;;  %v1714_v52 = vld [vmem:[#allocation5 + $0x130] sm:$0xf]  ;;  %v1578_v59 = vld [vmem:[#allocation5 + $0x20] sm:$0xf] }
  0x2b   :  { %552 = vmatpush.bf16.msra.mxu2 %v1731_v34  ;;  %v2239_v53 = vld [vmem:[#allocation5 + $0x134] sm:$0xf0]  ;;  %v1778_v54 = vld [vmem:[#allocation5 + $0x1b0] sm:$0xf]  ;;  %v1651_v57 = vor.u32 %v2223_v51, %v1650_v49  ;;  %v2205_v60 = vld [vmem:[#allocation5 + $0x24] sm:$0xf0] }
  0x2c   :  { %566 = vmatpush.bf16.msra.mxu3 %v1795_v38  ;;  %v2255_v55 = vld [vmem:[#allocation5 + $0x1b4] sm:$0xf0]  ;;  %v1715_v58 = vor.u32 %v2239_v53, %v1714_v52  ;;  %v1642_v61 = vld [vmem:[#allocation5 + $0xa0] sm:$0xf]  ;;  %v2221_v63 = vld [vmem:[#allocation5 + $0xa4] sm:$0xf0]  ;;  %v1579_v4 = vor.u32 %v2205_v60, %v1578_v59 }
  0x2d   :  { %525 = vmatpush.bf16.msra.mxu0 %v1595_v44  ;;  %v1779_v62 = vor.u32 %v2255_v55, %v1778_v54  ;;  %v1706_v0 = vld [vmem:[#allocation5 + $0x120] sm:$0xf]  ;;  %v2237_v1 = vld [vmem:[#allocation5 + $0x124] sm:$0xf0]  ;;  %v1570_v5 = vld [vmem:[#allocation5 + $0x10] sm:$0xf]  ;;  %v1643_v6 = vor.u32 %v2221_v63, %v1642_v61 }
  0x2e   :  { %539 = vmatpush.bf16.msra.mxu1 %v1659_v45  ;;  %v1770_v2 = vld [vmem:[#allocation5 + $0x1a0] sm:$0xf]  ;;  %v2253_v3 = vld [vmem:[#allocation5 + $0x1a4] sm:$0xf0]  ;;  %v1707_v7 = vor.u32 %v2237_v1, %v1706_v0  ;;  %v2203_v8 = vld [vmem:[#allocation5 + $0x14] sm:$0xf0] }
  0x2f   :  { %553 = vmatpush.bf16.msra.mxu2 %v1723_v46  ;;  %v1634_v9 = vld [vmem:[#allocation5 + $0x90] sm:$0xf]  ;;  %v2219_v10 = vld [vmem:[#allocation5 + $0x94] sm:$0xf0]  ;;  %v1771_v11 = vor.u32 %v2253_v3, %v1770_v2  ;;  %v1562_v16 = vld [vmem:[#allocation5] sm:$0xf]  ;;  %v1571_v18 = vor.u32 %v2203_v8, %v1570_v5 }
  0x30   :  { %567 = vmatpush.bf16.msra.mxu3 %v1787_v50  ;;  %v1698_v12 = vld [vmem:[#allocation5 + $0x110] sm:$0xf]  ;;  %v2235_v13 = vld [vmem:[#allocation5 + $0x114] sm:$0xf0]  ;;  %v2201_v17 = vld [vmem:[#allocation5 + $0x4] sm:$0xf0]  ;;  %v1635_v23 = vor.u32 %v2219_v10, %v1634_v9 }
  0x31   :  { %526 = vmatpush.bf16.msra.mxu0 %v1587_v56  ;;  %v1762_v14 = vld [vmem:[#allocation5 + $0x190] sm:$0xf]  ;;  %v2251_v15 = vld [vmem:[#allocation5 + $0x194] sm:$0xf0]  ;;  %v1626_v19 = vld [vmem:[#allocation5 + $0x80] sm:$0xf]  ;;  %v1699_v24 = vor.u32 %v2235_v13, %v1698_v12  ;;  %v1563_v35 = vor.u32 %v2201_v17, %v1562_v16 }
  0x32   :  { %540 = vmatpush.bf16.msra.mxu1 %v1651_v57  ;;  %v2217_v20 = vld [vmem:[#allocation5 + $0x84] sm:$0xf0]  ;;  %v1690_v21 = vld [vmem:[#allocation5 + $0x100] sm:$0xf]  ;;  %v2214_v27 = vld [vmem:[#allocation5 + $0x74] sm:$0xf]  ;;  %v1763_v28 = vor.u32 %v2251_v15, %v1762_v14 }
  0x33   :  { %554 = vmatpush.bf16.msra.mxu2 %v1715_v58  ;;  %v2233_v22 = vld [vmem:[#allocation5 + $0x104] sm:$0xf0]  ;;  %v1754_v25 = vld [vmem:[#allocation5 + $0x180] sm:$0xf]  ;;  %v1620_v29 = vld [vmem:[#allocation5 + $0x78] sm:$0xf0]  ;;  %v1627_v39 = vor.u32 %v2217_v20, %v1626_v19 }
  0x34   :  { %568 = vmatpush.bf16.msra.mxu3 %v1779_v62  ;;  %v2249_v26 = vld [vmem:[#allocation5 + $0x184] sm:$0xf0]  ;;  %v2230_v30 = vld [vmem:[#allocation5 + $0xf4] sm:$0xf]  ;;  %v1684_v31 = vld [vmem:[#allocation5 + $0xf8] sm:$0xf0]  ;;  %v1691_v40 = vor.u32 %v2233_v22, %v1690_v21  ;;  %v1623_v45 = vor.u32 %v2214_v27, %v1620_v29 }
  0x35   :  { %527 = vmatpush.bf16.msra.mxu0 %v1579_v4  ;;  %v2246_v32 = vld [vmem:[#allocation5 + $0x174] sm:$0xf]  ;;  %v1748_v33 = vld [vmem:[#allocation5 + $0x178] sm:$0xf0]  ;;  %v120_v41 = vld [vmem:[#allocation2] sm:$0xff]  ;;  %v1755_v44 = vor.u32 %v2249_v26, %v1754_v25  ;;  %v1687_v49 = vor.u32 %v2230_v30, %v1684_v31  ;;  %s1539_s18 = sshll.u32 %s2758_s8, 4  ;;  %s1540_s18 = int_to_ptr.hbm [resolvable:$true] %s1539_s18 }
  0x36   :  { %541 = vmatpush.bf16.msra.mxu1 %v1643_v6  ;;  %v2262_v34 = vld [vmem:[#allocation5 + $0x1f4] sm:$0xf]  ;;  %v1812_v36 = vld [vmem:[#allocation5 + $0x1f8] sm:$0xf0]  ;;  %v124_v42 = vld [vmem:[#allocation2 + $0x20] sm:$0xff]  ;;  %v1751_v50 = vor.u32 %v2246_v32, %v1748_v33  ;;  %s2651_s19 = smov [#allocation13]  }
  0x37   :  { %555 = vmatpush.bf16.msra.mxu2 %v1707_v7  ;;  %v122_v37 = vld [vmem:[#allocation2 + $0x10] sm:$0xff]  ;;  %v123_v43 = vld [vmem:[#allocation2 + $0x18] sm:$0xff]  ;;  %v2212_v47 = vld [vmem:[#allocation5 + $0x64] sm:$0xf]  ;;  %v1815_v54 = vor.u32 %v2262_v34, %v1812_v36  ;;  %v2720_v59 = vpack.c.bf16 %v124_v42, %v120_v41  ;;  %s1527_s1 = sshll.u32 %s2651_s19, 4  ;;  %s1529_s21 = sshll.u32 %s2757_s7, 4  ;;  %s1528_s1 = int_to_ptr.vmem [resolvable:$true] %s1527_s1  ;;  %s1530_s21 = int_to_ptr.hbm [resolvable:$true] %s1529_s21 }
  0x38   :  { %569 = vmatpush.bf16.msra.mxu3 %v1771_v11  ;;  %v126_v38 = vld [vmem:[#allocation2 + $0x30] sm:$0xff]  ;;  %v127_v46 = vld [vmem:[#allocation2 + $0x38] sm:$0xff]  ;;  %v1612_v48 = vld [vmem:[#allocation5 + $0x68] sm:$0xf0]  ;;  %vm1517_vm8 = vcmask 130112   ;;  %vm1520_vm9 = vcmask 122880  }
  0x39   :  { %528 = vmatpush.bf16.msra.mxu0 %v1571_v18  ;;  %v2228_v51 = vld [vmem:[#allocation5 + $0xe4] sm:$0xf]  ;;  %v121_v52 = vld [vmem:[#allocation2 + $0x8] sm:$0xff]  ;;  %v2718_v55 = vpack.c.bf16 %v126_v38, %v122_v37  ;;  %v2722_v60 = vpack.c.bf16 %v127_v46, %v123_v43  ;;  %v1615_v63 = vor.u32 %v2212_v47, %v1612_v48  ;;  %v2210_v3 = vld [vmem:[#allocation5 + $0x54] sm:$0xf] }
  0x3a   :  { %542 = vmatpush.bf16.msra.mxu1 %v1635_v23  ;;  %v125_v53 = vld [vmem:[#allocation2 + $0x28] sm:$0xff]  ;;  %v2244_v57 = vld [vmem:[#allocation5 + $0x164] sm:$0xf]  ;;  %v1604_v4 = vld [vmem:[#allocation5 + $0x58] sm:$0xf0] }
  0x3b   :  { %556 = vmatpush.bf16.msra.mxu2 %v1699_v24  ;;  %v1676_v56 = vld [vmem:[#allocation5 + $0xe8] sm:$0xf0]  ;;  %v2260_v61 = vld [vmem:[#allocation5 + $0x1e4] sm:$0xf]  ;;  %v2724_v0 = vpack.c.bf16 %v125_v53, %v121_v52  ;;  %v2226_v5 = vld [vmem:[#allocation5 + $0xd4] sm:$0xf]  ;;  %v1607_v12 = vor.u32 %v2210_v3, %v1604_v4 }
  0x3c   :  { %570 = vmatpush.bf16.msra.mxu3 %v1763_v28  ;;  %v1740_v58 = vld [vmem:[#allocation5 + $0x168] sm:$0xf0]  ;;  %v1679_v1 = vor.u32 %v2228_v51, %v1676_v56  ;;  %v1668_v7 = vld [vmem:[#allocation5 + $0xd8] sm:$0xf0]  ;;  %v2242_v8 = vld [vmem:[#allocation5 + $0x154] sm:$0xf] }
  0x3d   :  { %529 = vmatpush.bf16.msra.mxu0 %v1563_v35  ;;  %v1804_v62 = vld [vmem:[#allocation5 + $0x1e8] sm:$0xf0]  ;;  %v1743_v2 = vor.u32 %v2244_v57, %v1740_v58  ;;  %v1732_v9 = vld [vmem:[#allocation5 + $0x158] sm:$0xf0]  ;;  %v2258_v10 = vld [vmem:[#allocation5 + $0x1d4] sm:$0xf]  ;;  %v1671_v13 = vor.u32 %v2226_v5, %v1668_v7 }
  0x3e   :  { %543 = vmatpush.bf16.msra.mxu1 %v1627_v39  ;;  %v1807_v6 = vor.u32 %v2260_v61, %v1804_v62  ;;  %v1796_v11 = vld [vmem:[#allocation5 + $0x1d8] sm:$0xf0]  ;;  %v1735_v14 = vor.u32 %v2242_v8, %v1732_v9  ;;  %v2208_v15 = vld [vmem:[#allocation5 + $0x44] sm:$0xf]  ;;  %v1596_v16 = vld [vmem:[#allocation5 + $0x48] sm:$0xf0] }
  0x3f   :  { %557 = vmatpush.bf16.msra.mxu2 %v1691_v40  ;;  %v2224_v17 = vld [vmem:[#allocation5 + $0xc4] sm:$0xf]  ;;  %v1799_v18 = vor.u32 %v2258_v10, %v1796_v11  ;;  %v1660_v19 = vld [vmem:[#allocation5 + $0xc8] sm:$0xf0]  ;;  %v1599_v24 = vor.u32 %v2208_v15, %v1596_v16  ;;  %v2206_v27 = vld [vmem:[#allocation5 + $0x34] sm:$0xf] }
  0x40   :  { %571 = vmatpush.bf16.msra.mxu3 %v1755_v44  ;;  %530 = vmatmul.bf16.vlgmr.msra.gmra.mxu0 %v2720_v59  ;;  %v2240_v20 = vld [vmem:[#allocation5 + $0x144] sm:$0xf]  ;;  %v1724_v21 = vld [vmem:[#allocation5 + $0x148] sm:$0xf0]  ;;  %v1663_v25 = vor.u32 %v2224_v17, %v1660_v19  ;;  %v1588_v28 = vld [vmem:[#allocation5 + $0x38] sm:$0xf0] }
  0x41   :  { %578 = vmatpush.bf16.msrb.mxu0 %v1623_v45  ;;  %544 = vmatmul.bf16.vlgmr.msra.gmra.mxu1 %v2724_v0  ;;  %v2256_v22 = vld [vmem:[#allocation5 + $0x1c4] sm:$0xf]  ;;  %v1788_v23 = vld [vmem:[#allocation5 + $0x1c8] sm:$0xf0]  ;;  %v1727_v26 = vor.u32 %v2240_v20, %v1724_v21  ;;  %v2222_v29 = vld [vmem:[#allocation5 + $0xb4] sm:$0xf]  ;;  %v1591_v36 = vor.u32 %v2206_v27, %v1588_v28 }
  0x42   :  { %592 = vmatpush.bf16.msrb.mxu1 %v1687_v49  ;;  %558 = vmatmul.bf16.vlgmr.msra.gmra.mxu2 %v2718_v55  ;;  %v1791_v30 = vor.u32 %v2256_v22, %v1788_v23  ;;  %v1652_v31 = vld [vmem:[#allocation5 + $0xb8] sm:$0xf0]  ;;  %v2238_v32 = vld [vmem:[#allocation5 + $0x134] sm:$0xf]  ;;  %v2204_v39 = vld [vmem:[#allocation5 + $0x24] sm:$0xf] }
  0x43   :  { %606 = vmatpush.bf16.msrb.mxu2 %v1751_v50  ;;  %572 = vmatmul.bf16.vlgmr.msra.gmra.mxu3 %v2722_v60  ;;  %v1716_v33 = vld [vmem:[#allocation5 + $0x138] sm:$0xf0]  ;;  %v2254_v34 = vld [vmem:[#allocation5 + $0x1b4] sm:$0xf]  ;;  %v1655_v37 = vor.u32 %v2222_v29, %v1652_v31  ;;  %v1580_v40 = vld [vmem:[#allocation5 + $0x28] sm:$0xf0] }
  0x44   :  { %620 = vmatpush.bf16.msrb.mxu3 %v1815_v54  ;;  %v1780_v35 = vld [vmem:[#allocation5 + $0x1b8] sm:$0xf0]  ;;  %v1719_v38 = vor.u32 %v2238_v32, %v1716_v33  ;;  %v2220_v41 = vld [vmem:[#allocation5 + $0xa4] sm:$0xf]  ;;  %v1644_v43 = vld [vmem:[#allocation5 + $0xa8] sm:$0xf0]  ;;  %v1583_v48 = vor.u32 %v2204_v39, %v1580_v40 }
  0x45   :  { %579 = vmatpush.bf16.msrb.mxu0 %v1615_v63  ;;  %v1783_v42 = vor.u32 %v2254_v34, %v1780_v35  ;;  %v2236_v44 = vld [vmem:[#allocation5 + $0x124] sm:$0xf]  ;;  %v1708_v45 = vld [vmem:[#allocation5 + $0x128] sm:$0xf0]  ;;  %v1647_v49 = vor.u32 %v2220_v41, %v1644_v43  ;;  %v2202_v51 = vld [vmem:[#allocation5 + $0x14] sm:$0xf] }
  0x46   :  { %593 = vmatpush.bf16.msrb.mxu1 %v1679_v1  ;;  %v2252_v46 = vld [vmem:[#allocation5 + $0x1a4] sm:$0xf]  ;;  %v1772_v47 = vld [vmem:[#allocation5 + $0x1a8] sm:$0xf0]  ;;  %v1711_v50 = vor.u32 %v2236_v44, %v1708_v45  ;;  %v1572_v52 = vld [vmem:[#allocation5 + $0x18] sm:$0xf0] }
  0x47   :  { %607 = vmatpush.bf16.msrb.mxu2 %v1743_v2  ;;  %v2218_v53 = vld [vmem:[#allocation5 + $0x94] sm:$0xf]  ;;  %v1775_v54 = vor.u32 %v2252_v46, %v1772_v47  ;;  %v1636_v56 = vld [vmem:[#allocation5 + $0x98] sm:$0xf0]  ;;  %v1575_v63 = vor.u32 %v2202_v51, %v1572_v52  ;;  %v2200_v1 = vld [vmem:[#allocation5 + $0x4] sm:$0xf] }
  0x48   :  { %621 = vmatpush.bf16.msrb.mxu3 %v1807_v6  ;;  %v2234_v57 = vld [vmem:[#allocation5 + $0x114] sm:$0xf]  ;;  %v1700_v58 = vld [vmem:[#allocation5 + $0x118] sm:$0xf0]  ;;  %v1639_v2 = vor.u32 %v2218_v53, %v1636_v56  ;;  %v1564_v4 = vld [vmem:[#allocation5 + $0x8] sm:$0xf0] }
  0x49   :  { %580 = vmatpush.bf16.msrb.mxu0 %v1607_v12  ;;  %v2250_v61 = vld [vmem:[#allocation5 + $0x194] sm:$0xf]  ;;  %v1764_v62 = vld [vmem:[#allocation5 + $0x198] sm:$0xf0]  ;;  %v1703_v3 = vor.u32 %v2234_v57, %v1700_v58  ;;  %v2216_v5 = vld [vmem:[#allocation5 + $0x84] sm:$0xf] }
  0x4a   :  { %594 = vmatpush.bf16.msrb.mxu1 %v1671_v13  ;;  %v1628_v6 = vld [vmem:[#allocation5 + $0x88] sm:$0xf0]  ;;  %v1767_v7 = vor.u32 %v2250_v61, %v1764_v62  ;;  %v2232_v8 = vld [vmem:[#allocation5 + $0x104] sm:$0xf]  ;;  %v1874_v12 = vld [vmem:[#allocation8 + $0x70] sm:$0xf] }
  0x4b   :  { %608 = vmatpush.bf16.msrb.mxu2 %v1735_v14  ;;  %v1692_v9 = vld [vmem:[#allocation5 + $0x108] sm:$0xf0]  ;;  %v2248_v10 = vld [vmem:[#allocation5 + $0x184] sm:$0xf]  ;;  %v2279_v13 = vld [vmem:[#allocation8 + $0x74] sm:$0xf0]  ;;  %v1567_v14 = vor.u32 %v2200_v1, %v1564_v4  ;;  %v1631_v17 = vor.u32 %v2216_v5, %v1628_v6 }
  0x4c   :  { %622 = vmatpush.bf16.msrb.mxu3 %v1799_v18  ;;  %v1756_v11 = vld [vmem:[#allocation5 + $0x188] sm:$0xf0]  ;;  %v2278_v15 = vld [vmem:[#allocation8 + $0x74] sm:$0xf]  ;;  %v1876_v16 = vld [vmem:[#allocation8 + $0x78] sm:$0xf0]  ;;  %v1695_v18 = vor.u32 %v2232_v8, %v1692_v9  ;;  %v1875_v20 = vor.u32 %v2279_v13, %v1874_v12 }
  0x4d   :  { %581 = vmatpush.bf16.msrb.mxu0 %v1599_v24  ;;  %v1759_v19 = vor.u32 %v2248_v10, %v1756_v11  ;;  %v1879_v21 = vor.u32 %v2278_v15, %v1876_v16  ;;  %v1866_v22 = vld [vmem:[#allocation8 + $0x60] sm:$0xf]  ;;  %v2277_v23 = vld [vmem:[#allocation8 + $0x64] sm:$0xf0]  ;;  %v2276_v24 = vld [vmem:[#allocation8 + $0x64] sm:$0xf] }
  0x4e   :  { %595 = vmatpush.bf16.msrb.mxu1 %v1663_v25  ;;  %v1868_v25 = vld [vmem:[#allocation8 + $0x68] sm:$0xf0]  ;;  %v1858_v28 = vld [vmem:[#allocation8 + $0x50] sm:$0xf]  ;;  %v2275_v29 = vld [vmem:[#allocation8 + $0x54] sm:$0xf0] }
  0x4f   :  { %609 = vmatpush.bf16.msrb.mxu2 %v1727_v26  ;;  %v1867_v26 = vor.u32 %v2277_v23, %v1866_v22  ;;  %v1871_v27 = vor.u32 %v2276_v24, %v1868_v25  ;;  %v1859_v31 = vor.u32 %v2275_v29, %v1858_v28  ;;  %v1860_v32 = vld [vmem:[#allocation8 + $0x58] sm:$0xf0]  ;;  %v1850_v34 = vld [vmem:[#allocation8 + $0x40] sm:$0xf]  ;;  %v2272_v35 = vld [vmem:[#allocation8 + $0x44] sm:$0xf] }
  0x50   :  { %623 = vmatpush.bf16.msrb.mxu3 %v1791_v30  ;;  %v2274_v30 = vld [vmem:[#allocation8 + $0x54] sm:$0xf]  ;;  %v1844_v40 = vld [vmem:[#allocation8 + $0x38] sm:$0xf0]  ;;  %v2269_v43 = vld [vmem:[#allocation8 + $0x24] sm:$0xf0] }
  0x51   :  { %582 = vmatpush.bf16.msrb.mxu0 %v1591_v36  ;;  %v1863_v33 = vor.u32 %v2274_v30, %v1860_v32  ;;  %v2268_v44 = vld [vmem:[#allocation8 + $0x24] sm:$0xf]  ;;  %v1836_v46 = vld [vmem:[#allocation8 + $0x28] sm:$0xf0]  ;;  %v1828_v52 = vld [vmem:[#allocation8 + $0x18] sm:$0xf0] }
  0x52   :  { %596 = vmatpush.bf16.msrb.mxu1 %v1655_v37  ;;  %v1852_v37 = vld [vmem:[#allocation8 + $0x48] sm:$0xf0]  ;;  %v1839_v47 = vor.u32 %v2268_v44, %v1836_v46  ;;  %v1818_v53 = vld [vmem:[#allocation8] sm:$0xf]  ;;  %v2264_v57 = vld [vmem:[#allocation8 + $0x4] sm:$0xf] }
  0x53   :  { %610 = vmatpush.bf16.msrb.mxu2 %v1719_v38  ;;  %v2270_v38 = vld [vmem:[#allocation8 + $0x34] sm:$0xf]  ;;  %v1820_v58 = vld [vmem:[#allocation8 + $0x8] sm:$0xf0]  ;;  %v1938_v61 = vld [vmem:[#allocation8 + $0xf0] sm:$0xf] }
  0x54   :  { %624 = vmatpush.bf16.msrb.mxu3 %v1783_v42  ;;  %v1847_v41 = vor.u32 %v2270_v38, %v1844_v40  ;;  %v1834_v42 = vld [vmem:[#allocation8 + $0x20] sm:$0xf]  ;;  %v2295_v62 = vld [vmem:[#allocation8 + $0xf4] sm:$0xf0]  ;;  %v1940_v1 = vld [vmem:[#allocation8 + $0xf8] sm:$0xf0]  ;;  %v1823_v5 = vor.u32 %v2264_v57, %v1820_v58 }
  0x55   :  { %583 = vmatpush.bf16.msrb.mxu0 %v1583_v48  ;;  %v1835_v45 = vor.u32 %v2269_v43, %v1834_v42  ;;  %v1826_v48 = vld [vmem:[#allocation8 + $0x10] sm:$0xf]  ;;  %v2734_v6 = vld [vmem:[#allocation7] sm:$0x3]  ;;  %v2293_v8 = vld [vmem:[#allocation8 + $0xe4] sm:$0xf0] }
  0x56   :  { %597 = vmatpush.bf16.msrb.mxu1 %v1647_v49  ;;  %v2267_v49 = vld [vmem:[#allocation8 + $0x14] sm:$0xf0]  ;;  %v2292_v9 = vld [vmem:[#allocation8 + $0xe4] sm:$0xf]  ;;  %v198_v10 = vperm.slane %v2734_v6, 0 }
  0x57   :  { %611 = vmatpush.bf16.msrb.mxu2 %v1711_v50  ;;  %v2266_v50 = vld [vmem:[#allocation8 + $0x14] sm:$0xf]  ;;  %v1827_v51 = vor.u32 %v2267_v49, %v1826_v48  ;;  %v1932_v12 = vld [vmem:[#allocation8 + $0xe8] sm:$0xf0]  ;;  %v2291_v15 = vld [vmem:[#allocation8 + $0xd4] sm:$0xf0] }
  0x58   :  { %625 = vmatpush.bf16.msrb.mxu3 %v1775_v54  ;;  %v2265_v54 = vld [vmem:[#allocation8 + $0x4] sm:$0xf0]  ;;  %v1831_v56 = vor.u32 %v2266_v50, %v1828_v52  ;;  %v1935_v13 = vor.u32 %v2292_v9, %v1932_v12  ;;  %v2290_v16 = vld [vmem:[#allocation8 + $0xd4] sm:$0xf]  ;;  %v1914_v24 = vld [vmem:[#allocation8 + $0xc0] sm:$0xf] }
  0x59   :  { %584 = vmatpush.bf16.msrb.mxu0 %v1575_v63  ;;  %v2294_v63 = vld [vmem:[#allocation8 + $0xf4] sm:$0xf]  ;;  %v2289_v25 = vld [vmem:[#allocation8 + $0xc4] sm:$0xf0]  ;;  %v1916_v29 = vld [vmem:[#allocation8 + $0xc8] sm:$0xf0] }
  0x5a   :  { %598 = vmatpush.bf16.msrb.mxu1 %v1639_v2  ;;  %v1819_v2 = vor.u32 %v2265_v54, %v1818_v53  ;;  %v1943_v4 = vor.u32 %v2294_v63, %v1940_v1  ;;  %v1915_v28 = vor.u32 %v2289_v25, %v1914_v24  ;;  %v1898_v40 = vld [vmem:[#allocation8 + $0xa0] sm:$0xf]  ;;  %v2284_v42 = vld [vmem:[#allocation8 + $0xa4] sm:$0xf]  ;;  %v1890_v50 = vld [vmem:[#allocation8 + $0x90] sm:$0xf] }
  0x5b   :  { %612 = vmatpush.bf16.msrb.mxu2 %v1703_v3  ;;  %v1939_v3 = vor.u32 %v2295_v62, %v1938_v61  ;;  %v2282_v52 = vld [vmem:[#allocation8 + $0x94] sm:$0xf]  ;;  %v1892_v54 = vld [vmem:[#allocation8 + $0x98] sm:$0xf0]  ;;  %v2281_v57 = vld [vmem:[#allocation8 + $0x84] sm:$0xf0] }
  0x5c   :  { %626 = vmatpush.bf16.msrb.mxu3 %v1767_v7  ;;  %v1930_v7 = vld [vmem:[#allocation8 + $0xe0] sm:$0xf]  ;;  %v1895_v58 = vor.u32 %v2282_v52, %v1892_v54  ;;  %v2280_v61 = vld [vmem:[#allocation8 + $0x84] sm:$0xf]  ;;  %v1884_v62 = vld [vmem:[#allocation8 + $0x88] sm:$0xf0] }
  0x5d   :  { %585 = vmatpush.bf16.msrb.mxu0 %v1567_v14  ;;  %v1931_v11 = vor.u32 %v2293_v8, %v1930_v7  ;;  %v1922_v14 = vld [vmem:[#allocation8 + $0xd0] sm:$0xf]  ;;  %v1887_v1 = vor.u32 %v2280_v61, %v1884_v62  ;;  %v2058_v25 = vld [vmem:[#allocation11 + $0xe0] sm:$0xf]  ;;  %v2312_v54 = vld [vmem:[#allocation11 + $0x84] sm:$0xf] }
  0x5e   :  { %599 = vmatpush.bf16.msrb.mxu1 %v1631_v17  ;;  %v2350_v61 = vld [vmem:[#allocation11 + $0x1ac] sm:$0xf0]  ;;  %v2348_v62 = vld [vmem:[#allocation11 + $0x1a4] sm:$0xf] }
  0x5f   :  { %613 = vmatpush.bf16.msrb.mxu2 %v1695_v18  ;;  %v1923_v18 = vor.u32 %v2291_v15, %v1922_v14 }
  0x60   :  { %627 = vmatpush.bf16.msrb.mxu3 %v1759_v19  ;;  %586 = vmatmul.bf16.vlgmr.msrb.gmra.mxu0 %v2720_v59  ;;  %v2273_v59 = vld [vmem:[#allocation8 + $0x44] sm:$0xf0]  ;;  %v1924_v19 = vld [vmem:[#allocation8 + $0xd8] sm:$0xf0] }
  0x61   :  { %838 = vmatpush.bf16.msra.mxu0 %v1875_v20  ;;  %600 = vmatmul.bf16.vlgmr.msrb.gmra.mxu1 %v2724_v0  ;;  %v1851_v36 = vor.u32 %v2273_v59, %v1850_v34  ;;  %v1855_v0 = vor.u32 %v2272_v35, %v1852_v37  ;;  %v1927_v22 = vor.u32 %v2290_v16, %v1924_v19  ;;  %v1906_v34 = vld [vmem:[#allocation8 + $0xb0] sm:$0xf]  ;;  %v2287_v59 = vld [vmem:[#allocation8 + $0xb4] sm:$0xf0]  ;;  %v2286_v35 = vld [vmem:[#allocation8 + $0xb4] sm:$0xf] }
  0x62   :  { %614 = vmatmul.bf16.vlgmr.msrb.gmra.mxu2 %v2718_v55  ;;  %v1842_v55 = vld [vmem:[#allocation8 + $0x30] sm:$0xf]  ;;  %852 = vmatpush.bf16.msra.mxu1 %v1939_v3 }
  0x63   :  { %866 = vmatpush.bf16.msra.mxu2 %v1879_v21  ;;  %628 = vmatmul.bf16.vlgmr.msrb.gmra.mxu3 %v2722_v60  ;;  %v2271_v60 = vld [vmem:[#allocation8 + $0x34] sm:$0xf0] }
  0x64   :  { %v1843_v39 = vor.u32 %v2271_v60, %v1842_v55  ;;  %880 = vmatpush.bf16.msra.mxu3 %v1943_v4  ;;  %v1908_v55 = vld [vmem:[#allocation8 + $0xb8] sm:$0xf0] }
  0x65   :  { %839 = vmatpush.bf16.msra.mxu0 %v1867_v26  ;;  %v2288_v26 = vld [vmem:[#allocation8 + $0xc4] sm:$0xf]  ;;  %v1911_v60 = vor.u32 %v2286_v35, %v1908_v55 }
  0x66   :  { %853 = vmatpush.bf16.msra.mxu1 %v1931_v11  ;;  %v2186_v35 = vld [vmem:[#allocation11 + $0x1e0] sm:$0xf]  ;;  %v2356_v55 = vld [vmem:[#allocation11 + $0x1e4] sm:$0xf] }
  0x67   :  { %867 = vmatpush.bf16.msra.mxu2 %v1871_v27 }
  0x68   :  { %881 = vmatpush.bf16.msra.mxu3 %v1935_v13 }
  0x69   :  { %840 = vmatpush.bf16.msra.mxu0 %v1859_v31  ;;  %v1919_v31 = vor.u32 %v2288_v26, %v1916_v29  ;;  %v2326_v26 = vld [vmem:[#allocation11 + $0xec] sm:$0xf0]  ;;  %v2060_v29 = vld [vmem:[#allocation11 + $0xf0] sm:$0xf0] }
  0x6a   :  { %854 = vmatpush.bf16.msra.mxu1 %v1923_v18 }
  0x6b   :  { %868 = vmatpush.bf16.msra.mxu2 %v1863_v33 }
  0x6c   :  { %882 = vmatpush.bf16.msra.mxu3 %v1927_v22 }
  0x6d   :  { %841 = vmatpush.bf16.msra.mxu0 %v1851_v36 }
  0x6e   :  { %855 = vmatpush.bf16.msra.mxu1 %v1915_v28  ;;  %v2059_v28 = vor.u32 %v2326_v26, %v2058_v25 }
  0x6f   :  { %869 = vmatpush.bf16.msra.mxu2 %v1855_v0  ;;  %v1907_v0 = vor.u32 %v2287_v59, %v1906_v34  ;;  %v2044_v59 = vld [vmem:[#allocation11 + $0xd0] sm:$0xf0] }
  0x70   :  { %883 = vmatpush.bf16.msra.mxu3 %v1919_v31  ;;  %v2042_v31 = vld [vmem:[#allocation11 + $0xc0] sm:$0xf] }
  0x71   :  { %842 = vmatpush.bf16.msra.mxu0 %v1843_v39 }
  0x72   :  { %856 = vmatpush.bf16.msra.mxu1 %v1907_v0 }
  0x73   :  { %870 = vmatpush.bf16.msra.mxu2 %v1847_v41  ;;  %v2285_v41 = vld [vmem:[#allocation8 + $0xa4] sm:$0xf0] }
  0x74   :  { %884 = vmatpush.bf16.msra.mxu3 %v1911_v60  ;;  %v1899_v44 = vor.u32 %v2285_v41, %v1898_v40  ;;  %v2188_v60 = vld [vmem:[#allocation11 + $0x1f0] sm:$0xf0]  ;;  %v2318_v40 = vld [vmem:[#allocation11 + $0xac] sm:$0xf0]  ;;  %v2316_v41 = vld [vmem:[#allocation11 + $0xa4] sm:$0xf] }
  0x75   :  { %843 = vmatpush.bf16.msra.mxu0 %v1835_v45  ;;  %v1900_v45 = vld [vmem:[#allocation8 + $0xa8] sm:$0xf0] }
  0x76   :  { %v1903_v48 = vor.u32 %v2284_v42, %v1900_v45  ;;  %857 = vmatpush.bf16.msra.mxu1 %v1899_v44  ;;  %v2028_v42 = vld [vmem:[#allocation11 + $0xb0] sm:$0xf0]  ;;  %v2170_v45 = vld [vmem:[#allocation11 + $0x1c0] sm:$0xf] }
  0x77   :  { %871 = vmatpush.bf16.msra.mxu2 %v1839_v47  ;;  %v2031_v44 = vor.u32 %v2316_v41, %v2028_v42  ;;  %v2327_v41 = vld [vmem:[#allocation11 + $0xf4] sm:$0xf0] }
  0x78   :  { %885 = vmatpush.bf16.msra.mxu3 %v1903_v48 }
  0x79   :  { %844 = vmatpush.bf16.msra.mxu0 %v1827_v51  ;;  %v2283_v51 = vld [vmem:[#allocation8 + $0x94] sm:$0xf0] }
  0x7a   :  { %v1891_v53 = vor.u32 %v2283_v51, %v1890_v50  ;;  %v2010_v50 = vld [vmem:[#allocation11 + $0x80] sm:$0xf]  ;;  %v2314_v51 = vld [vmem:[#allocation11 + $0x8c] sm:$0xf0] }
  0x7b   :  { %872 = vmatpush.bf16.msra.mxu2 %v1831_v56  ;;  %v1882_v56 = vld [vmem:[#allocation8 + $0x80] sm:$0xf] }
  0x7c   :  { %858 = vmatpush.bf16.msra.mxu1 %v1891_v53  ;;  %v1883_v63 = vor.u32 %v2281_v57, %v1882_v56  ;;  %886 = vmatpush.bf16.msra.mxu3 %v1895_v58  ;;  %v2011_v53 = vor.u32 %v2314_v51, %v2010_v50  ;;  %v2012_v56 = vld [vmem:[#allocation11 + $0x90] sm:$0xf0]  ;;  %v2154_v57 = vld [vmem:[#allocation11 + $0x1a0] sm:$0xf] }
  0x7d   :  { %845 = vmatpush.bf16.msra.mxu0 %v1819_v2  ;;  %v2015_v58 = vor.u32 %v2312_v54, %v2012_v56  ;;  %v2092_v50 = vld [vmem:[#allocation11 + $0x130] sm:$0xf0]  ;;  %v2323_v54 = vld [vmem:[#allocation11 + $0xd4] sm:$0xf0]  ;;  %v2321_v56 = vld [vmem:[#allocation11 + $0xcc] sm:$0xf] }
  0x7f   :  { %873 = vmatpush.bf16.msra.mxu2 %v1823_v5  ;;  %v199_v5 = vperm.slane %v2734_v6, 1 }
  0x80   :  { %859 = vmatpush.bf16.msra.mxu1 %v1883_v63  ;;  %887 = vmatpush.bf16.msra.mxu3 %v1887_v1  ;;  %v2156_v63 = vld [vmem:[#allocation11 + $0x1b0] sm:$0xf0]  ;;  %v2155_v1 = vor.u32 %v2350_v61, %v2154_v57  ;;  %v2074_v61 = vld [vmem:[#allocation11 + $0x100] sm:$0xf] }
  0x81   :  { %1294 = vmatpush.bf16.msrb.mxu0 %v2059_v28  ;;  %v2302_v28 = vld [vmem:[#allocation11 + $0x2c] sm:$0xf0] }
  0xbd   :  { %v531_v17 = vpop.f32.mrf.mxu0 }
  0xbe   :  { %v532_v20 = vadd.f32 %v531_v17, %v198_v10  ;;  %v545_v21 = vpop.f32.mrf.mxu1 }
  0xc0   :  { %v546_v23 = vadd.f32 %v545_v21, %v532_v20 }
  0xc5   :  { %v559_v27 = vpop.f32.mrf.mxu2  ;;  %v533_v33 = vpop.f32.mrf.mxu0 }
  0xc6   :  { %v573_v30 = vpop.f32.mrf.mxu3  ;;  %v560_v32 = vadd.f32 %v559_v27, %v546_v23  ;;  %v534_v36 = vadd.f32 %v533_v33, %v198_v10  ;;  %v547_v37 = vpop.f32.mrf.mxu1  ;;  %v2324_v27 = vld [vmem:[#allocation11 + $0xe4] sm:$0xf] }
  0xc7   :  { %v2320_v33 = vld [vmem:[#allocation11 + $0xc4] sm:$0xf] }
  0xc8   :  { %v548_v38 = vadd.f32 %v547_v37, %v534_v36  ;;  %v574_v39 = vadd.f32 %v573_v30, %v560_v32  ;;  %v2063_v30 = vor.u32 %v2324_v27, %v2060_v29  ;;  %v2322_v32 = vld [vmem:[#allocation11 + $0xcc] sm:$0xf0]  ;;  %v2047_v37 = vor.u32 %v2320_v33, %v2044_v59  ;;  %v1962_v27 = vld [vmem:[#allocation11 + $0x20] sm:$0xf]  ;;  %v2300_v29 = vld [vmem:[#allocation11 + $0x24] sm:$0xf] }
  0xc9   :  { %v2043_v34 = vor.u32 %v2322_v32, %v2042_v31  ;;  %v2358_v36 = vld [vmem:[#allocation11 + $0x1ec] sm:$0xf0]  ;;  %v1964_v31 = vld [vmem:[#allocation11 + $0x30] sm:$0xf0]  ;;  %v2106_v33 = vld [vmem:[#allocation11 + $0x140] sm:$0xf] }
  0xca   :  { %2374 = vtanh.f32 %v574_v39  ;;  %1322 = vmatpush.bf16.msrb.mxu2 %v2063_v30  ;;  %v2187_v0 = vor.u32 %v2358_v36, %v2186_v35  ;;  %v2191_v39 = vor.u32 %v2356_v55, %v2188_v60  ;;  %v1963_v30 = vor.u32 %v2302_v28, %v1962_v27  ;;  %v2336_v59 = vld [vmem:[#allocation11 + $0x144] sm:$0xf]  ;;  %v2108_v36 = vld [vmem:[#allocation11 + $0x150] sm:$0xf0]  ;;  %v2298_v55 = vld [vmem:[#allocation11 + $0xc] sm:$0xf0] }
  0xcb   :  { %1295 = vmatpush.bf16.msrb.mxu0 %v2043_v34  ;;  %v1967_v32 = vor.u32 %v2300_v29, %v1964_v31  ;;  %v2338_v34 = vld [vmem:[#allocation11 + $0x14c] sm:$0xf0]  ;;  %v2296_v60 = vld [vmem:[#allocation11 + $0x4] sm:$0xf]  ;;  %v2020_v27 = vld [vmem:[#allocation11 + $0x98] sm:$0xf0] }
  0xcc   :  { %1308 = vmatpush.bf16.msrb.mxu1 %v2187_v0  ;;  %1336 = vmatpush.bf16.msrb.mxu3 %v2191_v39  ;;  %v2107_v35 = vor.u32 %v2338_v34, %v2106_v33  ;;  %v1946_v0 = vld [vmem:[#allocation11] sm:$0xf]  ;;  %v1948_v39 = vld [vmem:[#allocation11 + $0x10] sm:$0xf0]  ;;  %v2162_v29 = vld [vmem:[#allocation11 + $0x1a8] sm:$0xf] }
  0xcd   :  { %v561_v43 = vpop.f32.mrf.mxu2  ;;  %v1951_v42 = vor.u32 %v2296_v60, %v1948_v39  ;;  %v2349_v31 = vld [vmem:[#allocation11 + $0x1ac] sm:$0xf]  ;;  %v2164_v33 = vld [vmem:[#allocation11 + $0x1b8] sm:$0xf0]  ;;  %v2347_v60 = vld [vmem:[#allocation11 + $0x194] sm:$0xf0] }
  0xce   :  { %v562_v46 = vadd.f32 %v561_v43, %v548_v38  ;;  %v575_v47 = vpop.f32.mrf.mxu3  ;;  %v2026_v38 = vld [vmem:[#allocation11 + $0xa0] sm:$0xf]  ;;  %1323 = vmatpush.bf16.msrb.mxu2 %v2047_v37  ;;  %v2111_v37 = vor.u32 %v2336_v59, %v2108_v36  ;;  %v2167_v34 = vor.u32 %v2349_v31, %v2164_v33  ;;  %v2002_v59 = vld [vmem:[#allocation11 + $0x68] sm:$0xf]  ;;  %v2309_v36 = vld [vmem:[#allocation11 + $0x6c] sm:$0xf] }
  0xcf   :  { %v2027_v43 = vor.u32 %v2318_v40, %v2026_v38  ;;  %v1947_v38 = vor.u32 %v2298_v55, %v1946_v0  ;;  %v2066_v40 = vld [vmem:[#allocation11 + $0xe8] sm:$0xf]  ;;  %v2004_v0 = vld [vmem:[#allocation11 + $0x78] sm:$0xf0] }
  0xd0   :  { %v576_v49 = vadd.f32 %v575_v47, %v562_v46  ;;  %v2375_v2 = vpop.eup %2374  ;;  %v2354_v46 = vld [vmem:[#allocation11 + $0x1cc] sm:$0xf0]  ;;  %v2352_v47 = vld [vmem:[#allocation11 + $0x1c4] sm:$0xf]  ;;  %v2146_v55 = vld [vmem:[#allocation11 + $0x188] sm:$0xf] }
  0xd1   :  { %1296 = vmatpush.bf16.msrb.mxu0 %v2027_v43  ;;  %v2171_v48 = vor.u32 %v2354_v46, %v2170_v45  ;;  %v2067_v43 = vor.u32 %v2327_v41, %v2066_v40  ;;  %v2068_v45 = vld [vmem:[#allocation11 + $0xf8] sm:$0xf0]  ;;  %v2090_v46 = vld [vmem:[#allocation11 + $0x120] sm:$0xf]  ;;  %v2147_v39 = vor.u32 %v2347_v60, %v2146_v55  ;;  %v2345_v40 = vld [vmem:[#allocation11 + $0x18c] sm:$0xf] }
  0xd2   :  { %2376 = vtanh.f32 %v576_v49  ;;  %v2172_v49 = vld [vmem:[#allocation11 + $0x1d0] sm:$0xf0]  ;;  %1324 = vmatpush.bf16.msrb.mxu2 %v2031_v44  ;;  %v2325_v44 = vld [vmem:[#allocation11 + $0xec] sm:$0xf]  ;;  %v2148_v41 = vld [vmem:[#allocation11 + $0x198] sm:$0xf0] }
  0xd3   :  { %v2175_v52 = vor.u32 %v2352_v47, %v2172_v49  ;;  %1309 = vmatpush.bf16.msrb.mxu1 %v2171_v48  ;;  %v2071_v47 = vor.u32 %v2325_v44, %v2068_v45  ;;  %v2334_v48 = vld [vmem:[#allocation11 + $0x12c] sm:$0xf0]  ;;  %v2332_v49 = vld [vmem:[#allocation11 + $0x124] sm:$0xf]  ;;  %v2307_v44 = vld [vmem:[#allocation11 + $0x54] sm:$0xf0] }
  0xd4   :  { %v2091_v51 = vor.u32 %v2334_v48, %v2090_v46  ;;  %v2305_v45 = vld [vmem:[#allocation11 + $0x4c] sm:$0xf]  ;;  %v1988_v46 = vld [vmem:[#allocation11 + $0x58] sm:$0xf0] }
  0xd5   :  { %1337 = vmatpush.bf16.msrb.mxu3 %v2175_v52  ;;  %1297 = vmatpush.bf16.msrb.mxu0 %v2011_v53  ;;  %v2095_v52 = vor.u32 %v2332_v49, %v2092_v50  ;;  %v2050_v53 = vld [vmem:[#allocation11 + $0xc8] sm:$0xf]  ;;  %v1991_v48 = vor.u32 %v2305_v45, %v1988_v46  ;;  %v2343_v50 = vld [vmem:[#allocation11 + $0x174] sm:$0xf0] }
  0xd6   :  { %1325 = vmatpush.bf16.msrb.mxu2 %v2015_v58  ;;  %v2051_v57 = vor.u32 %v2323_v54, %v2050_v53  ;;  %v2052_v58 = vld [vmem:[#allocation11 + $0xd8] sm:$0xf0]  ;;  %v2130_v49 = vld [vmem:[#allocation11 + $0x168] sm:$0xf] }
  0xd7   :  { %1310 = vmatpush.bf16.msrb.mxu1 %v2155_v1  ;;  %v2131_v53 = vor.u32 %v2343_v50, %v2130_v49  ;;  %v2132_v54 = vld [vmem:[#allocation11 + $0x178] sm:$0xf0] }
  0xd8   :  { %v2377_v3 = vpop.eup %2376  ;;  %v964_v49 = vld [vmem:[%s2756_s6] sm:$0xf]  ;;  %s2650_s6 = smov [#allocation14]  }
  0xd9   :  { %v638_v4 = vpack.c.bf16 %v2377_v3, %v2375_v2  ;;  %v2159_v2 = vor.u32 %v2348_v62, %v2156_v63  ;;  %v1994_v3 = vld [vmem:[#allocation11 + $0x60] sm:$0xf]  ;;  %v2330_v62 = vld [vmem:[#allocation11 + $0x10c] sm:$0xf0]  ;;  %v2055_v63 = vor.u32 %v2321_v56, %v2052_v58  ;;  %v1970_v56 = vld [vmem:[#allocation11 + $0x28] sm:$0xf] }
  0xda   :  { %v2075_v1 = vor.u32 %v2330_v62, %v2074_v61  ;;  %v672_v58 = vld [vmem:[#allocation10] sm:$0x3]  ;;  %s1537_s15 = sshll.u32 %s2650_s6, 4  ;;  %s1538_s15 = int_to_ptr.vmem [resolvable:$true] %s1537_s15 }
  0xdb   :  { %846 = vmatmul.bf16.vlgmr.msra.gmra.mxu0 %v638_v4  ;;  %874 = vmatmul.bf16.vlgmr.msra.gmra.mxu2 %v638_v4  ;;  %v2310_v4 = vld [vmem:[#allocation11 + $0x6c] sm:$0xf0]  ;;  %v675_v31 = vperm.slane %v672_v58, 1 }
  0xdc   :  { %1338 = vmatpush.bf16.msrb.mxu3 %v2159_v2  ;;  %v2328_v2 = vld [vmem:[#allocation11 + $0x104] sm:$0xf] }
  0xdd   :  { %v587_v7 = vpop.f32.mrf.mxu0 }
  0xde   :  { %v588_v8 = vadd.f32 %v587_v7, %v199_v5  ;;  %v601_v9 = vpop.f32.mrf.mxu1  ;;  %v1995_v7 = vor.u32 %v2310_v4, %v1994_v3  ;;  %v2076_v3 = vld [vmem:[#allocation11 + $0x110] sm:$0xf0]  ;;  %v2194_v4 = vld [vmem:[#allocation11 + $0x1e8] sm:$0xf] }
  0xe0   :  { %v602_v10 = vadd.f32 %v601_v9, %v588_v8  ;;  %v1996_v8 = vld [vmem:[#allocation11 + $0x70] sm:$0xf0]  ;;  %v2138_v9 = vld [vmem:[#allocation11 + $0x180] sm:$0xf]  ;;  %1298 = vmatpush.bf16.msrb.mxu0 %v1995_v7  ;;  %v2359_v7 = vld [vmem:[#allocation11 + $0x1f4] sm:$0xf0] }
  0xe5   :  { %v615_v11 = vpop.f32.mrf.mxu2  ;;  %v589_v13 = vpop.f32.mrf.mxu0 }
  0xe6   :  { %v629_v12 = vpop.f32.mrf.mxu3  ;;  %v590_v14 = vadd.f32 %v589_v13, %v199_v5  ;;  %v616_v15 = vadd.f32 %v615_v11, %v602_v10  ;;  %v603_v16 = vpop.f32.mrf.mxu1  ;;  %v2308_v5 = vld [vmem:[#allocation11 + $0x64] sm:$0xf]  ;;  %v2346_v10 = vld [vmem:[#allocation11 + $0x18c] sm:$0xf0]  ;;  %v2140_v13 = vld [vmem:[#allocation11 + $0x190] sm:$0xf0] }
  0xe7   :  { %v1999_v11 = vor.u32 %v2308_v5, %v1996_v8  ;;  %v2079_v5 = vor.u32 %v2328_v2, %v2076_v3  ;;  %v2357_v8 = vld [vmem:[#allocation11 + $0x1ec] sm:$0xf]  ;;  %v2114_v2 = vld [vmem:[#allocation11 + $0x148] sm:$0xf] }
  0xe8   :  { %v604_v17 = vadd.f32 %v603_v16, %v590_v14  ;;  %v630_v18 = vadd.f32 %v629_v12, %v616_v15  ;;  %v2344_v12 = vld [vmem:[#allocation11 + $0x184] sm:$0xf]  ;;  %v1978_v14 = vld [vmem:[#allocation11 + $0x40] sm:$0xf]  ;;  %v2139_v15 = vor.u32 %v2346_v10, %v2138_v9  ;;  %v2306_v16 = vld [vmem:[#allocation11 + $0x4c] sm:$0xf0]  ;;  %v2195_v10 = vor.u32 %v2359_v7, %v2194_v4 }
  0xe9   :  { %1326 = vmatpush.bf16.msrb.mxu2 %v1999_v11  ;;  %v2196_v9 = vld [vmem:[#allocation11 + $0x1f8] sm:$0xf0]  ;;  %v2339_v4 = vld [vmem:[#allocation11 + $0x154] sm:$0xf0] }
  0xea   :  { %2378 = vtanh.f32 %v630_v18  ;;  %v1980_v18 = vld [vmem:[#allocation11 + $0x50] sm:$0xf0]  ;;  %1311 = vmatpush.bf16.msrb.mxu1 %v2139_v15  ;;  %v2199_v11 = vor.u32 %v2357_v8, %v2196_v9  ;;  %v2116_v7 = vld [vmem:[#allocation11 + $0x158] sm:$0xf0]  ;;  %v2115_v8 = vor.u32 %v2339_v4, %v2114_v2 }
  0xed   :  { %v617_v19 = vpop.f32.mrf.mxu2 }
  0xee   :  { %v618_v20 = vadd.f32 %v617_v19, %v604_v17  ;;  %v631_v21 = vpop.f32.mrf.mxu3  ;;  %v2304_v17 = vld [vmem:[#allocation11 + $0x44] sm:$0xf]  ;;  %v2143_v19 = vor.u32 %v2344_v12, %v2140_v13  ;;  %v2034_v12 = vld [vmem:[#allocation11 + $0xa8] sm:$0xf]  ;;  %v2319_v13 = vld [vmem:[#allocation11 + $0xb4] sm:$0xf0] }
  0xef   :  { %v2035_v15 = vor.u32 %v2319_v13, %v2034_v12  ;;  %v2297_v12 = vld [vmem:[#allocation11 + $0xc] sm:$0xf] }
  0xf0   :  { %v632_v22 = vadd.f32 %v631_v21, %v618_v20  ;;  %v2379_v23 = vpop.eup %2378  ;;  %v2122_v20 = vld [vmem:[#allocation11 + $0x160] sm:$0xf]  ;;  %v2342_v21 = vld [vmem:[#allocation11 + $0x16c] sm:$0xf0]  ;;  %1339 = vmatpush.bf16.msrb.mxu3 %v2143_v19  ;;  %v2355_v19 = vld [vmem:[#allocation11 + $0x1d4] sm:$0xf0] }
  0xf1   :  { %v2123_v25 = vor.u32 %v2342_v21, %v2122_v20  ;;  %v2353_v20 = vld [vmem:[#allocation11 + $0x1cc] sm:$0xf] }
  0xf2   :  { %2380 = vtanh.f32 %v632_v22  ;;  %v1979_v22 = vor.u32 %v2306_v16, %v1978_v14  ;;  %v2317_v14 = vld [vmem:[#allocation11 + $0xac] sm:$0xf]  ;;  %v2036_v16 = vld [vmem:[#allocation11 + $0xb8] sm:$0xf0] }
  0xf3   :  { %1312 = vmatpush.bf16.msrb.mxu1 %v2123_v25  ;;  %v2313_v25 = vld [vmem:[#allocation11 + $0x8c] sm:$0xf] }
  0xf4   :  { %1299 = vmatpush.bf16.msrb.mxu0 %v1979_v22  ;;  %v2180_v22 = vld [vmem:[#allocation11 + $0x1d8] sm:$0xf0]  ;;  %v2023_v28 = vor.u32 %v2313_v25, %v2020_v27  ;;  %v2331_v27 = vld [vmem:[#allocation11 + $0x114] sm:$0xf0] }
  0xf7   :  { %1313 = vmatpush.bf16.msrb.mxu1 %v2107_v35  ;;  %v2311_v35 = vld [vmem:[#allocation11 + $0x74] sm:$0xf0] }
  0xf8   :  { %v2381_v6 = vpop.eup %2380  ;;  %1300 = vmatpush.bf16.msrb.mxu0 %v1963_v30  ;;  %v2351_v30 = vld [vmem:[#allocation11 + $0x1b4] sm:$0xf0] }
  0xf9   :  { %v639_v24 = vpack.c.bf16 %v2381_v6, %v2379_v23  ;;  %v2340_v23 = vld [vmem:[#allocation11 + $0x164] sm:$0xf]  ;;  %v2124_v6 = vld [vmem:[#allocation11 + $0x170] sm:$0xf0] }
  0xfa   :  { %v2127_v26 = vor.u32 %v2340_v23, %v2124_v6  ;;  %v2183_v23 = vor.u32 %v2353_v20, %v2180_v22  ;;  %v2018_v6 = vld [vmem:[#allocation11 + $0x88] sm:$0xf]  ;;  %v674_v20 = vperm.slane %v672_v58, 0 }
  0xfb   :  { %860 = vmatmul.bf16.vlgmr.msra.gmra.mxu1 %v639_v24  ;;  %888 = vmatmul.bf16.vlgmr.msra.gmra.mxu3 %v639_v24  ;;  %v1983_v24 = vor.u32 %v2304_v17, %v1980_v18  ;;  %v2039_v17 = vor.u32 %v2317_v14, %v2036_v16  ;;  %v2178_v18 = vld [vmem:[#allocation11 + $0x1c8] sm:$0xf]  ;;  %v1956_v14 = vld [vmem:[#allocation11 + $0x18] sm:$0xf0]  ;;  %v2335_v16 = vld [vmem:[#allocation11 + $0x134] sm:$0xf0] }
  0xfc   :  { %1340 = vmatpush.bf16.msrb.mxu3 %v2127_v26  ;;  %1301 = vmatpush.bf16.msrb.mxu0 %v1947_v38  ;;  %v2179_v21 = vor.u32 %v2355_v19, %v2178_v18  ;;  %v2007_v38 = vor.u32 %v2309_v36, %v2004_v0  ;;  %v2333_v18 = vld [vmem:[#allocation11 + $0x12c] sm:$0xf]  ;;  %v2100_v19 = vld [vmem:[#allocation11 + $0x138] sm:$0xf0] }
  0xfd   :  { %1327 = vmatpush.bf16.msrb.mxu2 %v1983_v24  ;;  %1314 = vmatpush.bf16.msrb.mxu1 %v2091_v51  ;;  %v2315_v24 = vld [vmem:[#allocation11 + $0x94] sm:$0xf0]  ;;  %v2341_v51 = vld [vmem:[#allocation11 + $0x16c] sm:$0xf] }
  0xfe   :  { %v2019_v26 = vor.u32 %v2315_v24, %v2018_v6  ;;  %v2135_v61 = vor.u32 %v2341_v51, %v2132_v54  ;;  %v2103_v6 = vor.u32 %v2333_v18, %v2100_v19  ;;  %v967_v51 = vperm.slane %v964_v49, 1 }
 0x100   :  { %1341 = vmatpush.bf16.msrb.mxu3 %v2111_v37  ;;  %1350 = vmatpush.bf16.msra.mxu0 %v2067_v43  ;;  %v2003_v37 = vor.u32 %v2311_v35, %v2002_v59  ;;  %v2151_v43 = vor.u32 %v2345_v40, %v2148_v41 }
 0x101   :  { %1328 = vmatpush.bf16.msrb.mxu2 %v1967_v32  ;;  %1315 = vmatpush.bf16.msrb.mxu1 %v2075_v1  ;;  %v2163_v32 = vor.u32 %v2351_v30, %v2162_v29  ;;  %v1972_v1 = vld [vmem:[#allocation11 + $0x38] sm:$0xf0] }
 0x102   :  { %v2084_v30 = vld [vmem:[#allocation11 + $0x118] sm:$0xf0] }
 0x104   :  { %1342 = vmatpush.bf16.msrb.mxu3 %v2095_v52  ;;  %1351 = vmatpush.bf16.msra.mxu0 %v2051_v57  ;;  %v2303_v57 = vld [vmem:[#allocation11 + $0x34] sm:$0xf0] }
 0x105   :  { %1329 = vmatpush.bf16.msrb.mxu2 %v1951_v42  ;;  %1364 = vmatpush.bf16.msra.mxu1 %v2195_v10  ;;  %v1986_v42 = vld [vmem:[#allocation11 + $0x48] sm:$0xf]  ;;  %v1971_v62 = vor.u32 %v2303_v57, %v1970_v56 }
 0x106   :  { %v1954_v10 = vld [vmem:[#allocation11 + $0x8] sm:$0xf] }
 0x108   :  { %1343 = vmatpush.bf16.msrb.mxu3 %v2079_v5  ;;  %1352 = vmatpush.bf16.msra.mxu0 %v2035_v15  ;;  %v2337_v5 = vld [vmem:[#allocation11 + $0x14c] sm:$0xf]  ;;  %v2098_v15 = vld [vmem:[#allocation11 + $0x128] sm:$0xf] }
 0x109   :  { %1378 = vmatpush.bf16.msra.mxu2 %v2071_v47  ;;  %1365 = vmatpush.bf16.msra.mxu1 %v2179_v21  ;;  %v1987_v47 = vor.u32 %v2307_v44, %v1986_v42  ;;  %v2119_v9 = vor.u32 %v2337_v5, %v2116_v7 }
 0x10c   :  { %1392 = vmatpush.bf16.msra.mxu3 %v2199_v11  ;;  %1353 = vmatpush.bf16.msra.mxu0 %v2019_v26  ;;  %v2299_v11 = vld [vmem:[#allocation11 + $0x14] sm:$0xf0]  ;;  %v2082_v26 = vld [vmem:[#allocation11 + $0x108] sm:$0xf] }
 0x10d   :  { %1379 = vmatpush.bf16.msra.mxu2 %v2055_v63  ;;  %1366 = vmatpush.bf16.msra.mxu1 %v2163_v32  ;;  %v2301_v63 = vld [vmem:[#allocation11 + $0x2c] sm:$0xf]  ;;  %v1955_v13 = vor.u32 %v2299_v11, %v1954_v10  ;;  %v2083_v29 = vor.u32 %v2331_v27, %v2082_v26  ;;  %v969_v11 = vperm.slane %v964_v49, 3 }
 0x10e   :  { %v1975_v3 = vor.u32 %v2301_v63, %v1972_v1  ;;  %v968_v1 = vperm.slane %v964_v49, 2 }
 0x110   :  { %1393 = vmatpush.bf16.msra.mxu3 %v2183_v23  ;;  %1354 = vmatpush.bf16.msra.mxu0 %v2003_v37  ;;  %v2099_v23 = vor.u32 %v2335_v16, %v2098_v15 }
 0x111   :  { %1380 = vmatpush.bf16.msra.mxu2 %v2039_v17  ;;  %1367 = vmatpush.bf16.msra.mxu1 %v2147_v39  ;;  %v1959_v17 = vor.u32 %v2297_v12, %v1956_v14 }
 0x114   :  { %1394 = vmatpush.bf16.msra.mxu3 %v2167_v34  ;;  %1355 = vmatpush.bf16.msra.mxu0 %v1987_v47 }
 0x115   :  { %1381 = vmatpush.bf16.msra.mxu2 %v2023_v28  ;;  %1368 = vmatpush.bf16.msra.mxu1 %v2131_v53  ;;  %v2329_v28 = vld [vmem:[#allocation11 + $0x10c] sm:$0xf] }
 0x116   :  { %v2087_v34 = vor.u32 %v2329_v28, %v2084_v30 }
 0x118   :  { %1395 = vmatpush.bf16.msra.mxu3 %v2151_v43  ;;  %1356 = vmatpush.bf16.msra.mxu0 %v1971_v62 }
 0x119   :  { %1382 = vmatpush.bf16.msra.mxu2 %v2007_v38  ;;  %1369 = vmatpush.bf16.msra.mxu1 %v2115_v8 }
 0x11c   :  { %1396 = vmatpush.bf16.msra.mxu3 %v2135_v61  ;;  %1357 = vmatpush.bf16.msra.mxu0 %v1955_v13 }
 0x11d   :  { %1383 = vmatpush.bf16.msra.mxu2 %v1991_v48  ;;  %1370 = vmatpush.bf16.msra.mxu1 %v2099_v23 }
 0x120   :  { %1397 = vmatpush.bf16.msra.mxu3 %v2119_v9 }
 0x121   :  { %1384 = vmatpush.bf16.msra.mxu2 %v1975_v3  ;;  %1371 = vmatpush.bf16.msra.mxu1 %v2083_v29 }
 0x124   :  { %1398 = vmatpush.bf16.msra.mxu3 %v2103_v6 }
 0x125   :  { %1385 = vmatpush.bf16.msra.mxu2 %v1959_v17 }
 0x128   :  { %1399 = vmatpush.bf16.msra.mxu3 %v2087_v34 }
 0x158   :  { %v847_v52 = vpop.f32.mrf.mxu0 }
 0x159   :  { %v848_v24 = vadd.f32 %v847_v52, %v674_v20  ;;  %v966_v52 = vperm.slane %v964_v49, 0 }
 0x15e   :  { %v875_v21 = vpop.f32.mrf.mxu2 }
 0x15f   :  { %v876_v37 = vadd.f32 %v875_v21, %v675_v31 }
 0x160   :  { %v849_v25 = vpop.f32.mrf.mxu0 }
 0x161   :  { %v850_v59 = vadd.f32 %v849_v25, %v674_v20 }
 0x166   :  { %v877_v0 = vpop.f32.mrf.mxu2 }
 0x167   :  { %v878_v60 = vadd.f32 %v877_v0, %v675_v31 }
 0x178   :  { %v861_v22 = vpop.f32.mrf.mxu1 }
 0x179   :  { %v862_v32 = vadd.f32 %v861_v22, %v848_v24 }
 0x17b   :  { %2382 = vtanh.f32 %v862_v32 }
 0x17e   :  { %v889_v33 = vpop.f32.mrf.mxu3 }
 0x17f   :  { %v890_v55 = vadd.f32 %v889_v33, %v876_v37 }
 0x180   :  { %v863_v35 = vpop.f32.mrf.mxu1 }
 0x181   :  { %v864_v36 = vadd.f32 %v863_v35, %v850_v59  ;;  %v2383_v40 = vpop.eup %2382 }
 0x183   :  { %2384 = vtanh.f32 %v864_v36 }
 0x184   :  { %2386 = vtanh.f32 %v890_v55 }
 0x186   :  { %v891_v38 = vpop.f32.mrf.mxu3 }
 0x187   :  { %v892_v39 = vadd.f32 %v891_v38, %v878_v60 }
 0x189   :  { %v2385_v41 = vpop.eup %2384  ;;  %2388 = vtanh.f32 %v892_v39 }
 0x18a   :  { %v898_v42 = vpack.c.bf16 %v2385_v41, %v2383_v40  ;;  %v2387_v43 = vpop.eup %2386 }
 0x18c   :  { %1302 = vmatmul.bf16.vlgmr.msrb.gmra.mxu0 %v898_v42  ;;  %1330 = vmatmul.bf16.vlgmr.msrb.gmra.mxu2 %v898_v42 }
 0x18f   :  { %v2389_v44 = vpop.eup %2388 }
 0x190   :  { %v899_v45 = vpack.c.bf16 %v2389_v44, %v2387_v43 }
 0x192   :  { %1316 = vmatmul.bf16.vlgmr.msrb.gmra.mxu1 %v899_v45  ;;  %1344 = vmatmul.bf16.vlgmr.msrb.gmra.mxu3 %v899_v45 }
 0x19c   :  { %1358 = vmatmul.bf16.vlgmr.msra.gmra.mxu0 %v898_v42  ;;  %1386 = vmatmul.bf16.vlgmr.msra.gmra.mxu2 %v898_v42 }
 0x1a2   :  { %1372 = vmatmul.bf16.vlgmr.msra.gmra.mxu1 %v899_v45  ;;  %1400 = vmatmul.bf16.vlgmr.msra.gmra.mxu3 %v899_v45 }
 0x209   :  { %v1303_v46 = vpop.f32.mrf.mxu0 }
 0x20a   :  { %v1304_v56 = vadd.f32 %v1303_v46, %v966_v52 }
 0x20f   :  { %v1317_v47 = vpop.f32.mrf.mxu1  ;;  %v1331_v48 = vpop.f32.mrf.mxu2 }
 0x210   :  { %v1332_v54 = vadd.f32 %v1331_v48, %v967_v51  ;;  %v1318_v62 = vadd.f32 %v1317_v47, %v1304_v56 }
 0x211   :  { %v1305_v50 = vpop.f32.mrf.mxu0 }
 0x212   :  { %v1306_v5 = vadd.f32 %v1305_v50, %v966_v52 }
 0x215   :  { %v1345_v53 = vpop.f32.mrf.mxu3 }
 0x216   :  { %v1346_v61 = vadd.f32 %v1345_v53, %v1332_v54 }
 0x217   :  { %v1319_v57 = vpop.f32.mrf.mxu1  ;;  %v1333_v58 = vpop.f32.mrf.mxu2 }
 0x218   :  { %2390 = vtanh.f32 %v1346_v61  ;;  %v1334_v3 = vadd.f32 %v1333_v58, %v967_v51  ;;  %v1320_v12 = vadd.f32 %v1319_v57, %v1306_v5 }
 0x219   :  { %v1359_v63 = vpop.f32.mrf.mxu0  ;;  %2392 = vtanh.f32 %v1318_v62 }
 0x21a   :  { %v1360_v4 = vadd.f32 %v1359_v63, %v968_v1 }
 0x21d   :  { %v1347_v2 = vpop.f32.mrf.mxu3 }
 0x21e   :  { %v1348_v9 = vadd.f32 %v1347_v2, %v1334_v3  ;;  %v2391_v13 = vpop.eup %2390 }
 0x21f   :  { %v1373_v7 = vpop.f32.mrf.mxu1  ;;  %v1387_v8 = vpop.f32.mrf.mxu2  ;;  %v1415_v17 = vmul.f32 0.5, %v2391_v13 }
 0x220   :  { %v1374_v10 = vadd.f32 %v1373_v7, %v1360_v4  ;;  %v2393_v14 = vpop.eup %2392  ;;  %v1388_v16 = vadd.f32 %v1387_v8, %v969_v11 }
 0x221   :  { %v1361_v15 = vpop.f32.mrf.mxu0  ;;  %v1414_v19 = vmul.f32 0.5, %v2393_v14  ;;  %v1424_v24 = vmul.f32 1.442695, %v1415_v17 }
 0x222   :  { %2394 = vtanh.f32 %v1374_v10  ;;  %v1362_v20 = vadd.f32 %v1361_v15, %v968_v1 }
 0x223   :  { %2396 = vtanh.f32 %v1348_v9  ;;  %v1422_v28 = vmul.f32 1.442695, %v1414_v19 }
 0x224   :  { %2398 = vtanh.f32 %v1320_v12 }
 0x225   :  { %v1401_v18 = vpop.f32.mrf.mxu3 }
 0x226   :  { %v1402_v21 = vadd.f32 %v1401_v18, %v1388_v16 }
 0x227   :  { %v1375_v22 = vpop.f32.mrf.mxu1  ;;  %v1389_v26 = vpop.f32.mrf.mxu2 }
 0x228   :  { %v2395_v23 = vpop.eup %2394  ;;  %2400 = vtanh.f32 %v1402_v21  ;;  %v1376_v6 = vadd.f32 %v1375_v22, %v1362_v20  ;;  %v1390_v31 = vadd.f32 %v1389_v26, %v969_v11  ;;  %v2426_v20 = vld [vmem:[#allocation2] sm:$0xff]  ;;  %v2427_v22 = vld [vmem:[#allocation2 + $0x8] sm:$0xff] }
 0x229   :  { %v1416_v25 = vmul.f32 0.5, %v2395_v23  ;;  %v2397_v27 = vpop.eup %2396 }
 0x22a   :  { %2402 = vtanh.f32 %v1376_v6  ;;  %v2399_v29 = vpop.eup %2398  ;;  %v1419_v32 = vmul.f32 0.5, %v2397_v27 }
 0x22b   :  { %v1426_v30 = vmul.f32 1.442695, %v1416_v25  ;;  %2404 = vpow2.f32 %v1424_v24  ;;  %v1418_v59 = vmul.f32 0.5, %v2399_v29  ;;  %v2428_v24 = vld [vmem:[#allocation2 + $0x10] sm:$0xff]  ;;  %v2429_v29 = vld [vmem:[#allocation2 + $0x18] sm:$0xff] }
 0x22c   :  { %2406 = vpow2.f32 %v1422_v28  ;;  %v1432_v0 = vmul.f32 1.442695, %v1419_v32 }
 0x22d   :  { %v1403_v33 = vpop.f32.mrf.mxu3  ;;  %2408 = vpow2.f32 %v1426_v30  ;;  %v1430_v38 = vmul.f32 1.442695, %v1418_v59 }
 0x22e   :  { %v2401_v34 = vpop.eup %2400  ;;  %v1404_v35 = vadd.f32 %v1403_v33, %v1390_v31 }
 0x22f   :  { %v1417_v36 = vmul.f32 0.5, %v2401_v34 }
 0x230   :  { %v2403_v37 = vpop.eup %2402  ;;  %2410 = vtanh.f32 %v1404_v35 }
 0x231   :  { %v1428_v55 = vmul.f32 1.442695, %v1417_v36  ;;  %v1420_v60 = vmul.f32 0.5, %v2403_v37  ;;  %v2405_v39 = vpop.eup %2404  ;;  %v2430_v37 = vld [vmem:[#allocation2 + $0x20] sm:$0xff] }
 0x232   :  { %v2407_v41 = vpop.eup %2406 }
 0x233   :  { %2412 = vpow2.f32 %v1428_v55  ;;  %v1434_v40 = vmul.f32 1.442695, %v1420_v60  ;;  %v2409_v42 = vpop.eup %2408  ;;  %v1438_v44 = vadd.f32 %v2407_v41, %v2405_v39  ;;  %v2431_v55 = vld [vmem:[#allocation2 + $0x28] sm:$0xff] }
 0x234   :  { %2414 = vpow2.f32 %v1432_v0 }
 0x235   :  { %2416 = vpow2.f32 %v1430_v38  ;;  %v1439_v46 = vadd.f32 %v2409_v42, %v1438_v44  ;;  %v2432_v38 = vld [vmem:[#allocation2 + $0x30] sm:$0xff] }
 0x236   :  { %v2411_v43 = vpop.eup %2410  ;;  %2418 = vpow2.f32 %v1434_v40 }
 0x237   :  { %v1421_v45 = vmul.f32 0.5, %v2411_v43 }
 0x239   :  { %v2413_v47 = vpop.eup %2412  ;;  %v1436_v48 = vmul.f32 1.442695, %v1421_v45  ;;  %v1512_v45 = vlaneseq }
 0x23a   :  { %v1440_v49 = vadd.f32 %v2413_v47, %v1439_v46  ;;  %v2415_v50 = vpop.eup %2414 }
 0x23b   :  { %2420 = vpow2.f32 %v1436_v48  ;;  %v2417_v51 = vpop.eup %2416 }
 0x23c   :  { %1441 = vadd.xlane.f32.xlu0 %v1440_v49  ;;  %v2419_v52 = vpop.eup %2418  ;;  %v1443_v53 = vadd.f32 %v2417_v51, %v2415_v50 }
 0x23e   :  { %v1444_v54 = vadd.f32 %v2419_v52, %v1443_v53 }
 0x241   :  { %v2421_v56 = vpop.eup %2420 }
 0x242   :  { %v1445_v57 = vadd.f32 %v2421_v56, %v1444_v54 }
 0x244   :  { %1446 = vadd.xlane.f32.xlu0 %v1445_v57 }
 0x2af   :  { %v1442_v58 = vpop.xlane.xlu0 %1441 }
 0x2b0   :  { %2422 = vrcp.f32 %v1442_v58  ;;  %v1459_v2 = vand.u32 2147483648, %v1442_v58  ;;  %v1457_v4 = vand.u32 2147483647, %v1442_v58  ;;  %vm1453_vm1 = vweird.f32 %v1442_v58 }
 0x2b2   :  { %v1460_v8 = vor.u32 1.1754944e-38, %v1459_v2  ;;  %vm1458_vm3 = vcmp.eq.f32.partialorder %v1457_v4, 8.507059e+37 }
 0x2b6   :  { %v2423_v61 = vpop.eup %2422 }
 0x2b7   :  { %v1449_v62 = vmul.f32 %v2423_v61, %v1442_v58  ;;  %v1447_v63 = vpop.xlane.xlu0 %1446  ;;  %vm1454_vm0 = vweird.f32 %v2423_v61 }
 0x2b8   :  { %2424 = vrcp.f32 %v1447_v63  ;;  %vm1455_vm2 = vmor %vm1453_vm1, %vm1454_vm0  ;;  %v1471_v16 = vand.u32 2147483647, %v1447_v63  ;;  %v1473_v17 = vand.u32 2147483648, %v1447_v63  ;;  %vm1467_vm5 = vweird.f32 %v1447_v63 }
 0x2b9   :  { %v1450_v1 = vsub.f32 1.0, %v1449_v62 }
 0x2ba   :  { %v1474_v27 = vor.u32 1.1754944e-38, %v1473_v17  ;;  %vm1472_vm7 = vcmp.eq.f32.partialorder %v1471_v16, 8.507059e+37 }
 0x2bb   :  { %v1451_v3 = vmul.f32 %v2423_v61, %v1450_v1 }
 0x2bd   :  { %v1452_v5 = vadd.f32 %v2423_v61, %v1451_v3 }
 0x2be   :  { %v2425_v7 = vpop.eup %2424 }
 0x2bf   :  { %v1463_v9 = vmul.f32 %v2425_v7, %v1447_v63  ;;  %v1456_v10 = vsel %vm1455_vm2, %v2423_v61, %v1452_v5  ;;  %vm1468_vm4 = vweird.f32 %v2425_v7 }
 0x2c0   :  { %v1461_v11 = vsel %vm1458_vm3, %v1460_v8, %v1456_v10  ;;  %vm1469_vm6 = vmor %vm1467_vm5, %vm1468_vm4 }
 0x2c1   :  { %v1464_v12 = vsub.f32 1.0, %v1463_v9  ;;  %v1476_v13 = vmul.f32 %v2407_v41, %v1461_v11  ;;  %v1477_v14 = vmul.f32 %v2405_v39, %v1461_v11  ;;  %v1478_v15 = vmul.f32 %v2409_v42, %v1461_v11  ;;  %v2433_v41 = vld [vmem:[#allocation2 + $0x38] sm:$0xff] }
 0x2c2   :  { %v1479_v18 = vmul.f32 %v2413_v47, %v1461_v11  ;;  %v1513_v47 = vand.u32 127, %v1512_v45 }
 0x2c3   :  { %v1465_v19 = vmul.f32 %v2425_v7, %v1464_v12  ;;  %1485 = vst [vmem:[#allocation14 + $0x8] sm:$0xff] %v1477_v14  ;;  %v1492_v21 = vmul.f32 %v2426_v20, %v1476_v13  ;;  %v1493_v23 = vmul.f32 %v2427_v22, %v1477_v14  ;;  %v1494_v25 = vmul.f32 %v2428_v24, %v1478_v15 }
 0x2c4   :  { %1486 = vst [vmem:[#allocation14 + $0x10] sm:$0xff] %v1478_v15  ;;  %v1495_v30 = vmul.f32 %v2429_v29, %v1479_v18  ;;  %v1515_v48 = vadd.s32 4294967288, %v1513_v47 }
 0x2c5   :  { %v1466_v6 = vadd.f32 %v2425_v7, %v1465_v19  ;;  %1487 = vst [vmem:[#allocation14 + $0x18] sm:$0xff] %v1479_v18  ;;  %v1500_v26 = vadd.f32 %v1493_v23, %v1492_v21 }
 0x2c6   :  { %1484 = vst [vmem:[#allocation14] sm:$0xff] %v1476_v13 }
 0x2c7   :  { %v1470_v28 = vsel %vm1469_vm6, %v2425_v7, %v1466_v6  ;;  %v1501_v31 = vadd.f32 %v1500_v26, %v1494_v25 }
 0x2c8   :  { %v1475_v32 = vsel %vm1472_vm7, %v1474_v27, %v1470_v28 }
 0x2c9   :  { %v1502_v33 = vadd.f32 %v1501_v31, %v1495_v30  ;;  %v1480_v34 = vmul.f32 %v2417_v51, %v1475_v32  ;;  %v1481_v59 = vmul.f32 %v2415_v50, %v1475_v32  ;;  %v1482_v35 = vmul.f32 %v2419_v52, %v1475_v32 }
 0x2ca   :  { %v1483_v36 = vmul.f32 %v2421_v56, %v1475_v32 }
 0x2cb   :  { %1503 = vadd.xlane.f32.xlu1 %v1502_v33  ;;  %1489 = vst [vmem:[#allocation14 + $0x28] sm:$0xff] %v1481_v59  ;;  %v1496_v0 = vmul.f32 %v2430_v37, %v1480_v34  ;;  %v1497_v60 = vmul.f32 %v2431_v55, %v1481_v59  ;;  %v1498_v39 = vmul.f32 %v2432_v38, %v1482_v35 }
 0x2cc   :  { %1490 = vst [vmem:[#allocation14 + $0x30] sm:$0xff] %v1482_v35  ;;  %v1499_v42 = vmul.f32 %v2433_v41, %v1483_v36 }
 0x2cd   :  { %1491 = vst [vmem:[#allocation14 + $0x38] sm:$0xff] %v1483_v36  ;;  %v1505_v40 = vadd.f32 %v1497_v60, %v1496_v0 }
 0x2ce   :  { %1488 = vst [vmem:[#allocation14 + $0x20] sm:$0xff] %v1480_v34 }
 0x2cf   :  { %v1506_v43 = vadd.f32 %v1505_v40, %v1498_v39  ;;  %1545 = dma.vmem_to_hbm [thread:$0]  %s1538_s15, 1024, %s1540_s18, [#allocation15], %s2643_s23, %s2643_s23, %s2644_s24  }
 0x2d1   :  { %v1507_v44 = vadd.f32 %v1506_v43, %v1499_v42 }
 0x2d3   :  { %1508 = vadd.xlane.f32.xlu1 %v1507_v44 }
 0x33e   :  { %v1504_v46 = vpop.xlane.xlu1 %1503 }
 0x33f   :  { %v1514_v50 = vperm.slane %v1504_v46, %v1513_v47 }
 0x346   :  { %v1509_v49 = vpop.xlane.xlu1 %1508 }
 0x347   :  { %v1516_v51 = vperm.slane %v1509_v49, %v1515_v48 }
 0x349   :  { %v1518_v52 = vsel %vm1517_vm8, %v1516_v51, %v1514_v50 }
 0x34a   :  { %1521 = vst.msk [vmem:[#allocation13] sm:$0x1] %vm1520_vm9, %v1518_v52 }
 0x34b   :  { %1532 = dma.vmem_to_hbm [thread:$0]  %s1528_s1, 16, %s1530_s21, [#allocation4]  }
 0x34c   :  { %2634 = dma.done.wait [#allocation4], 16  }
 0x34d   :  { %2635 = vsyncadd [#allocation4], 4294967280 }
 0x34e   :  { %2636 = dma.done.wait [#allocation15], 1024  }
 0x34f   :  { %2637 = vsyncadd [#allocation15], 4294966272 }
 0x350   :  { %1554 = vsyncpa [#allocation3], 1 }
 0x351   :  { %1555 = vsyncpa [#allocation6], 1 }
 0x352   :  { %1556 = vsyncpa [#allocation9], 1 }
 0x353   :  { %1557 = vsyncpa [#allocation12], 1 }
 0x354   :  { %1558 = vsyncpa [#allocation4], 1 }
 0x355   :  { %1559 = vsyncpa [#allocation15], 1 }

</bundles_post_ra>
